<compile_context>
chip_gen: v7x
topology: tpu7x:2x2x1
jax: 0.10.0
libtpu: 0.0.40
codegen_flags: <defaults>
</compile_context>

<pallas_src>
import numpy as np
import jax
import jax.numpy as jnp
from jax.experimental import pallas as pl
from jax.experimental.pallas import tpu as pltpu

COST_CLASS = 100.0
COST_OKS = 10.0
COST_KPT = 1.0
NUM_KPT = 14          # fixed by the sigma table in the reference module
ROW_CHUNK = 8         # register-resident sub-tile height (sublane-aligned)

SIGMAS = np.array(
    [0.26, 0.35, 0.79, 0.79, 0.72, 0.72, 0.62, 0.62, 1.07, 1.07, 0.87, 0.87, 0.89, 0.89],
    dtype=np.float32,
) / 10.0
VARIANCES = (SIGMAS * 2.0) ** 2  # [K]


def _round_up(x, m):
    return ((x + m - 1) // m) * m


def matcher_cost_kernel(logits_ref, onehot_ref, kpt_ref, tkT_ref, ninvd_ref,
                        c_ref, zl_ref):
    # ---- Stage 1: gather logits[:, tgt_ids] for the whole tile with one MXU
    # matmul.  precision=HIGHEST keeps it f32-exact (onehot entries are 0/1),
    # which the 100x-weighted classification cost needs for the 1e-4 tolerance.
    zl_ref[...] = jnp.dot(logits_ref[...], onehot_ref[...],
                          precision=jax.lax.Precision.HIGHEST,
                          preferred_element_type=jnp.float32)

    g_pad = c_ref.shape[1]
    n_chunks = c_ref.shape[0] // ROW_CHUNK

    # folded cost weights (host constants)
    w_l1 = COST_KPT / (2.0 * NUM_KPT)    # 1/28   (avg_factor = 2*K)
    w_oks = -COST_OKS / NUM_KPT          # -10/14
    w_pos = COST_CLASS * 0.25            # 25
    w_neg = COST_CLASS * 0.75            # 75

    # ---- Stage 2: row-chunked, register-resident accumulation.  Each chunk's
    # l1/oks accumulators and dx/dy/dz/sq temporaries stay within a handful of
    # vregs, so the 14-iteration keypoint unroll never spills to VMEM.
    @pl.loop(0, n_chunks)
    def _(r):
        r0 = pl.multiple_of(r * ROW_CHUNK, ROW_CHUNK)
        rows = pl.ds(r0, ROW_CHUNK)

        kpt = kpt_ref[rows, :]                                   # [RC, 3K]
        l1 = jnp.zeros((ROW_CHUNK, g_pad), jnp.float32)
        oks = jnp.zeros((ROW_CHUNK, g_pad), jnp.float32)
        for k in range(NUM_KPT):                                 # static unroll, K=14
            dx = kpt[:, 3 * k:3 * k + 1] - tkT_ref[3 * k:3 * k + 1, :]
            dy = kpt[:, 3 * k + 1:3 * k + 2] - tkT_ref[3 * k + 1:3 * k + 2, :]
            dz = kpt[:, 3 * k + 2:3 * k + 3] - tkT_ref[3 * k + 2:3 * k + 3, :]
            l1 = l1 + (jnp.abs(dx) + jnp.abs(dy) + jnp.abs(dz))
            sq = dx * dx + dy * dy
            oks = oks + jnp.exp(sq * ninvd_ref[k:k + 1, :])      # pre-negated denom

        # Focal classification cost AFTER the keypoint loop (never live across it).
        logits = logits_ref[rows, :]                             # [RC, C]
        m = jnp.max(logits, axis=-1, keepdims=True)              # [RC, 1]
        log_s = jnp.log(jnp.sum(jnp.exp(logits - m), axis=-1, keepdims=True))
        logp = (zl_ref[rows, :] - m) - log_s                     # exact log softmax(tgt)
        p = jnp.exp(logp)                                        # softmax prob of tgt class
        one_m_p = 1.0 - p
        cls = (w_neg * (p * p)) * jnp.log(one_m_p + 1e-12) \
            - (w_pos * (one_m_p * one_m_p)) * logp

        c_ref[rows, :] = w_l1 * l1 + w_oks * oks + cls


def matcher_cost(pred_logits, pred_keypoints, tgt_ids, tgt_areas, tgt_keypoints,
                 tile_n=512):
    """Computes the [bs*nq, total_gt] matching cost matrix with a Pallas kernel."""
    bs, nq, num_classes = pred_logits.shape
    N = bs * nq
    G = int(tgt_ids.shape[0])
    D = pred_keypoints.shape[-1]          # K*3
    K = D // 3
    assert K == NUM_KPT, "sigma table fixes K = 14"

    if G == 0:
        # A batch with no ground-truth targets: nothing to match.
        return jnp.zeros((N, 0), jnp.float32)

    # ---- padding: lane-dense G, sublane-aligned N tiles -----------------------
    G_pad = _round_up(G, 128)
    N8 = _round_up(N, 8)
    # Keep >= 2 grid steps when the problem allows so the "parallel" axis can
    # shard across both TensorCores on v7x.  Per-step VMEM footprint is only a
    # few MB even at TILE_N=512, G_pad=512 — far under the scoped limit on all
    # generations, so the biggest tile wins otherwise.
    if N8 > ROW_CHUNK:
        TILE_N = min(tile_n, _round_up((N8 + 1) // 2, 8))
    else:
        TILE_N = N8
    N_pad = _round_up(N8, TILE_N)

    logits = pred_logits.reshape(N, num_classes).astype(jnp.float32)
    kpt = pred_keypoints.reshape(N, D).astype(jnp.float32)
    if N_pad > N:
        logits = jnp.pad(logits, ((0, N_pad - N), (0, 0)))
        kpt = jnp.pad(kpt, ((0, N_pad - N), (0, 0)))

    # Target-side shared operands, padded on the lane (G) axis.  Padded columns
    # produce garbage-but-finite cost values and MUST be sliced off (done below).
    pad_g = G_pad - G
    onehot = jax.nn.one_hot(tgt_ids, num_classes, dtype=jnp.float32).T   # [C, G]
    onehot = jnp.pad(onehot, ((0, 0), (0, pad_g)))
    if pad_g > 0:
        onehot = onehot.at[0, G:].set(1.0)     # keep padded columns finite
    tkT = tgt_keypoints.reshape(G, D).astype(jnp.float32).T              # [D, G]
    tkT = jnp.pad(tkT, ((0, 0), (0, pad_g)))
    var = jnp.asarray(VARIANCES[:K])                                      # [K]
    # pre-negated OKS denominator: kernel computes exp(sq * ninvd), no negate
    ninvd = -1.0 / (2.0 * tgt_areas.astype(jnp.float32)[None, :] * var[:, None])
    ninvd = jnp.pad(ninvd, ((0, 0), (0, pad_g)), constant_values=-1.0)    # [K, Gp]

    grid = (N_pad // TILE_N,)
    in_specs = [
        pl.BlockSpec((TILE_N, num_classes), lambda i: (i, 0)),   # logits (N-tiled)
        pl.BlockSpec((num_classes, G_pad), lambda i: (0, 0)),    # one-hot (shared)
        pl.BlockSpec((TILE_N, D), lambda i: (i, 0)),             # pred kpt (N-tiled)
        pl.BlockSpec((D, G_pad), lambda i: (0, 0)),              # tgt kpt^T (shared)
        pl.BlockSpec((K, G_pad), lambda i: (0, 0)),              # -1/(2*area*var) (shared)
    ]
    out_spec = pl.BlockSpec((TILE_N, G_pad), lambda i: (i, 0))

    cost = pl.pallas_call(
        matcher_cost_kernel,
        out_shape=jax.ShapeDtypeStruct((N_pad, G_pad), jnp.float32),
        grid=grid,
        in_specs=in_specs,
        out_specs=out_spec,
        scratch_shapes=[pltpu.VMEM((TILE_N, G_pad), jnp.float32)],   # gathered logits zl
        compiler_params=pltpu.CompilerParams(
            dimension_semantics=("parallel",),
            vmem_limit_bytes=32 * 1024 * 1024),
    )(logits, onehot, kpt, tkT, ninvd)

    return cost[:N, :G]


def _reference_cost(pred_logits, pred_keypoints, tgt_ids, tgt_areas, tgt_keypoints):
    """Pure-JAX reference mirroring the PyTorch forward (pre-Hungarian)."""
    bs, nq, C = pred_logits.shape
    N = bs * nq
    G = tgt_ids.shape[0]
    p = jax.nn.softmax(pred_logits.reshape(N, C), axis=-1)
    neg = -jnp.log(1 - p + 1e-12) * 0.75 * p ** 2
    pos = -jnp.log(p + 1e-12) * 0.25 * (1 - p) ** 2
    cls_cost = (pos - neg)[:, tgt_ids]
    kp = pred_keypoints.reshape(N, -1)
    tk = tgt_keypoints.reshape(G, -1)
    cost_kpt = jnp.abs(kp[:, None, :] - tk[None, :, :]).sum(-1) / (2.0 * NUM_KPT)
    kp3 = kp.reshape(N, NUM_KPT, 3)
    tk3 = tk.reshape(G, NUM_KPT, 3)
    sq = (kp3[:, None, :, 0] - tk3[None, :, :, 0]) ** 2 + \
         (kp3[:, None, :, 1] - tk3[None, :, :, 1]) ** 2
    sq0 = sq / (tgt_areas[None, :, None] * VARIANCES[None, None, :] * 2.0)
    oks = jnp.exp(-sq0).sum(-1) / NUM_KPT
    return COST_KPT * cost_kpt + COST_CLASS * cls_cost + COST_OKS * (-oks)


if __name__ == "__main__":
    key = jax.random.PRNGKey(0)
    bs, num_queries, num_classes = 2, 8, 4
    sizes = [3, 2]                      # num ground-truth per image
    G = sum(sizes)
    D = NUM_KPT * 3

    k1, k2, k3, k4, k5 = jax.random.split(key, 5)
    pred_logits = jax.random.normal(k1, (bs, num_queries, num_classes), jnp.float32)
    pred_keypoints = jax.random.uniform(k2, (bs, num_queries, D), jnp.float32)
    tgt_ids = jax.random.randint(k3, (G,), 0, num_classes, jnp.int32)
    tgt_areas = jax.random.uniform(k4, (G,), jnp.float32, 0.5, 2.0)
    tgt_keypoints = jax.random.uniform(k5, (G, D), jnp.float32)

    C = matcher_cost(pred_logits, pred_keypoints, tgt_ids, tgt_areas, tgt_keypoints)
    C = jax.block_until_ready(C)

    # correctness check vs. pure-JAX reference
    C_ref = _reference_cost(pred_logits, pred_keypoints, tgt_ids, tgt_areas, tgt_keypoints)
    np.testing.assert_allclose(np.asarray(C), np.asarray(C_ref), rtol=1e-4, atol=1e-4)

    # Hungarian assignment (host-side, not a TPU-kernel op)
    # TODO(synk): linear_sum_assignment has no Pallas equivalent; done on host with scipy.
    C_np = np.asarray(C).reshape(bs, num_queries, G)
    try:
        from scipy.optimize import linear_sum_assignment
        splits = np.split(C_np, np.cumsum(sizes)[:-1], axis=-1)
        indices = [linear_sum_assignment(c[i]) for i, c in enumerate(splits)]
        _ = [(np.asarray(i, np.int64), np.asarray(j, np.int64)) for i, j in indices]
    except ImportError:
        pass

    print("KERNEL_OK")
</pallas_src>

<mosaic_0001>
module attributes {stable_mosaic.version = 11 : i64} {
  func.func @matcher_cost_kernel(%arg0: i32, %arg1: memref<8x4xf32, #tpu.memory_space<vmem>>, %arg2: memref<4x128xf32, #tpu.memory_space<vmem>>, %arg3: memref<8x42xf32, #tpu.memory_space<vmem>>, %arg4: memref<42x128xf32, #tpu.memory_space<vmem>>, %arg5: memref<14x128xf32, #tpu.memory_space<vmem>>, %arg6: memref<8x128xf32, #tpu.memory_space<vmem>>, %arg7: memref<8x128xf32, #tpu.memory_space<vmem>>) attributes {dimension_semantics = [#tpu.dimension_semantics<parallel>], iteration_bounds = array<i64: 2>, scalar_prefetch = 0 : i64, scratch_operands = 1 : i64, tpu.core_type = #tpu.core_type<tc>, window_params = [{transform_indices = @transform_0, window_bounds = array<i64: 8, 4>}, {pipeline_mode = #tpu.pipeline_mode<synchronous>, transform_indices = @transform_1, window_bounds = array<i64: 4, 128>}, {transform_indices = @transform_2, window_bounds = array<i64: 8, 42>}, {pipeline_mode = #tpu.pipeline_mode<synchronous>, transform_indices = @transform_3, window_bounds = array<i64: 42, 128>}, {pipeline_mode = #tpu.pipeline_mode<synchronous>, transform_indices = @transform_4, window_bounds = array<i64: 14, 128>}, {transform_indices = @transform_5, window_bounds = array<i64: 8, 128>}]} {
    %c0 = arith.constant 0 : index
    %c0_0 = arith.constant 0 : index
    %0 = vector.load %arg1[%c0, %c0_0] : memref<8x4xf32, #tpu.memory_space<vmem>>, vector<8x4xf32>
    %c0_1 = arith.constant 0 : index
    %c0_2 = arith.constant 0 : index
    %1 = vector.load %arg2[%c0_1, %c0_2] : memref<4x128xf32, #tpu.memory_space<vmem>>, vector<4x128xf32>
    %cst = arith.constant dense<0.000000e+00> : vector<8x128xf32>
    %2 = tpu.matmul %0, %1, %cst {dimension_numbers = #tpu.dot_dimension_numbers<[1], [0], [0], [1], [0, 0, 1, 1], [], []>, precision = #tpu.contract_precision<fp32>} : vector<8x4xf32>, vector<4x128xf32>, vector<8x128xf32> -> vector<8x128xf32>
    %c0_3 = arith.constant 0 : index
    %c0_4 = arith.constant 0 : index
    %3 = vector.load %arg7[%c0_3, %c0_4] : memref<8x128xf32, #tpu.memory_space<vmem>>, vector<8x128xf32>
    tpu.vector_store %arg7[%c0_3, %c0_4], %2 {strides = array<i32>} : memref<8x128xf32, #tpu.memory_space<vmem>>, vector<8x128xf32>,
    %c0_i32 = arith.constant 0 : i32
    %c1_i32 = arith.constant 1 : i32
    %4 = arith.muli %c0_i32, %c1_i32 : i32
    %c0_i32_5 = arith.constant 0 : i32
    %5 = arith.addi %c0_i32_5, %4 : i32
    %c8_i32 = arith.constant 8 : i32
    %6 = arith.muli %5, %c8_i32 : i32
    %7 = tpu.assume_multiple %6, 8 : i32
    %8 = arith.index_cast %7 : i32 to index
    %c0_6 = arith.constant 0 : index
    %9 = vector.load %arg3[%8, %c0_6] : memref<8x42xf32, #tpu.memory_space<vmem>>, vector<8x42xf32>
    %cst_7 = arith.constant 0.000000e+00 : f32
    %10 = vector.broadcast %cst_7 : f32 to vector<8x128xf32>
    %cst_8 = arith.constant 0.000000e+00 : f32
    %11 = vector.broadcast %cst_8 : f32 to vector<8x128xf32>
    %12 = vector.extract_strided_slice %9 {offsets = [0, 0], sizes = [8, 1], strides = [1, 1]} : vector<8x42xf32> to vector<8x1xf32>
    %c0_9 = arith.constant 0 : index
    %c0_10 = arith.constant 0 : index
    %13 = vector.load %arg4[%c0_9, %c0_10] : memref<42x128xf32, #tpu.memory_space<vmem>>, vector<1x128xf32>
    %14 = vector.broadcast %12 : vector<8x1xf32> to vector<8x128xf32>
    %15 = vector.broadcast %13 : vector<1x128xf32> to vector<8x128xf32>
    %16 = arith.subf %14, %15 : vector<8x128xf32>
    %17 = vector.extract_strided_slice %9 {offsets = [0, 1], sizes = [8, 1], strides = [1, 1]} : vector<8x42xf32> to vector<8x1xf32>
    %c1 = arith.constant 1 : index
    %c0_11 = arith.constant 0 : index
    %18 = vector.load %arg4[%c1, %c0_11] : memref<42x128xf32, #tpu.memory_space<vmem>>, vector<1x128xf32>
    %19 = vector.broadcast %17 : vector<8x1xf32> to vector<8x128xf32>
    %20 = vector.broadcast %18 : vector<1x128xf32> to vector<8x128xf32>
    %21 = arith.subf %19, %20 : vector<8x128xf32>
    %22 = vector.extract_strided_slice %9 {offsets = [0, 2], sizes = [8, 1], strides = [1, 1]} : vector<8x42xf32> to vector<8x1xf32>
    %c2 = arith.constant 2 : index
    %c0_12 = arith.constant 0 : index
    %23 = vector.load %arg4[%c2, %c0_12] : memref<42x128xf32, #tpu.memory_space<vmem>>, vector<1x128xf32>
    %24 = vector.broadcast %22 : vector<8x1xf32> to vector<8x128xf32>
    %25 = vector.broadcast %23 : vector<1x128xf32> to vector<8x128xf32>
    %26 = arith.subf %24, %25 : vector<8x128xf32>
    %27 = math.absf %16 : vector<8x128xf32>
    %28 = math.absf %21 : vector<8x128xf32>
    %29 = arith.addf %27, %28 : vector<8x128xf32>
    %30 = math.absf %26 : vector<8x128xf32>
    %31 = arith.addf %29, %30 : vector<8x128xf32>
    %32 = arith.addf %10, %31 : vector<8x128xf32>
    %33 = arith.mulf %16, %16 : vector<8x128xf32>
    %34 = arith.mulf %21, %21 : vector<8x128xf32>
    %35 = arith.addf %33, %34 : vector<8x128xf32>
    %c0_13 = arith.constant 0 : index
    %c0_14 = arith.constant 0 : index
    %36 = vector.load %arg5[%c0_13, %c0_14] : memref<14x128xf32, #tpu.memory_space<vmem>>, vector<1x128xf32>
    %37 = vector.broadcast %36 : vector<1x128xf32> to vector<8x128xf32>
    %38 = arith.mulf %35, %37 : vector<8x128xf32>
    %39 = math.exp %38 : vector<8x128xf32>
    %40 = arith.addf %11, %39 : vector<8x128xf32>
    %41 = vector.extract_strided_slice %9 {offsets = [0, 3], sizes = [8, 1], strides = [1, 1]} : vector<8x42xf32> to vector<8x1xf32>
    %c3 = arith.constant 3 : index
    %c0_15 = arith.constant 0 : index
    %42 = vector.load %arg4[%c3, %c0_15] : memref<42x128xf32, #tpu.memory_space<vmem>>, vector<1x128xf32>
    %43 = vector.broadcast %41 : vector<8x1xf32> to vector<8x128xf32>
    %44 = vector.broadcast %42 : vector<1x128xf32> to vector<8x128xf32>
    %45 = arith.subf %43, %44 : vector<8x128xf32>
    %46 = vector.extract_strided_slice %9 {offsets = [0, 4], sizes = [8, 1], strides = [1, 1]} : vector<8x42xf32> to vector<8x1xf32>
    %c4 = arith.constant 4 : index
    %c0_16 = arith.constant 0 : index
    %47 = vector.load %arg4[%c4, %c0_16] : memref<42x128xf32, #tpu.memory_space<vmem>>, vector<1x128xf32>
    %48 = vector.broadcast %46 : vector<8x1xf32> to vector<8x128xf32>
    %49 = vector.broadcast %47 : vector<1x128xf32> to vector<8x128xf32>
    %50 = arith.subf %48, %49 : vector<8x128xf32>
    %51 = vector.extract_strided_slice %9 {offsets = [0, 5], sizes = [8, 1], strides = [1, 1]} : vector<8x42xf32> to vector<8x1xf32>
    %c5 = arith.constant 5 : index
    %c0_17 = arith.constant 0 : index
    %52 = vector.load %arg4[%c5, %c0_17] : memref<42x128xf32, #tpu.memory_space<vmem>>, vector<1x128xf32>
    %53 = vector.broadcast %51 : vector<8x1xf32> to vector<8x128xf32>
    %54 = vector.broadcast %52 : vector<1x128xf32> to vector<8x128xf32>
    %55 = arith.subf %53, %54 : vector<8x128xf32>
    %56 = math.absf %45 : vector<8x128xf32>
    %57 = math.absf %50 : vector<8x128xf32>
    %58 = arith.addf %56, %57 : vector<8x128xf32>
    %59 = math.absf %55 : vector<8x128xf32>
    %60 = arith.addf %58, %59 : vector<8x128xf32>
    %61 = arith.addf %32, %60 : vector<8x128xf32>
    %62 = arith.mulf %45, %45 : vector<8x128xf32>
    %63 = arith.mulf %50, %50 : vector<8x128xf32>
    %64 = arith.addf %62, %63 : vector<8x128xf32>
    %c1_18 = arith.constant 1 : index
    %c0_19 = arith.constant 0 : index
    %65 = vector.load %arg5[%c1_18, %c0_19] : memref<14x128xf32, #tpu.memory_space<vmem>>, vector<1x128xf32>
    %66 = vector.broadcast %65 : vector<1x128xf32> to vector<8x128xf32>
    %67 = arith.mulf %64, %66 : vector<8x128xf32>
    %68 = math.exp %67 : vector<8x128xf32>
    %69 = arith.addf %40, %68 : vector<8x128xf32>
    %70 = vector.extract_strided_slice %9 {offsets = [0, 6], sizes = [8, 1], strides = [1, 1]} : vector<8x42xf32> to vector<8x1xf32>
    %c6 = arith.constant 6 : index
    %c0_20 = arith.constant 0 : index
    %71 = vector.load %arg4[%c6, %c0_20] : memref<42x128xf32, #tpu.memory_space<vmem>>, vector<1x128xf32>
    %72 = vector.broadcast %70 : vector<8x1xf32> to vector<8x128xf32>
    %73 = vector.broadcast %71 : vector<1x128xf32> to vector<8x128xf32>
    %74 = arith.subf %72, %73 : vector<8x128xf32>
    %75 = vector.extract_strided_slice %9 {offsets = [0, 7], sizes = [8, 1], strides = [1, 1]} : vector<8x42xf32> to vector<8x1xf32>
    %c7 = arith.constant 7 : index
    %c0_21 = arith.constant 0 : index
    %76 = vector.load %arg4[%c7, %c0_21] : memref<42x128xf32, #tpu.memory_space<vmem>>, vector<1x128xf32>
    %77 = vector.broadcast %75 : vector<8x1xf32> to vector<8x128xf32>
    %78 = vector.broadcast %76 : vector<1x128xf32> to vector<8x128xf32>
    %79 = arith.subf %77, %78 : vector<8x128xf32>
    %80 = vector.extract_strided_slice %9 {offsets = [0, 8], sizes = [8, 1], strides = [1, 1]} : vector<8x42xf32> to vector<8x1xf32>
    %c8 = arith.constant 8 : index
    %c0_22 = arith.constant 0 : index
    %81 = vector.load %arg4[%c8, %c0_22] : memref<42x128xf32, #tpu.memory_space<vmem>>, vector<1x128xf32>
    %82 = vector.broadcast %80 : vector<8x1xf32> to vector<8x128xf32>
    %83 = vector.broadcast %81 : vector<1x128xf32> to vector<8x128xf32>
    %84 = arith.subf %82, %83 : vector<8x128xf32>
    %85 = math.absf %74 : vector<8x128xf32>
    %86 = math.absf %79 : vector<8x128xf32>
    %87 = arith.addf %85, %86 : vector<8x128xf32>
    %88 = math.absf %84 : vector<8x128xf32>
    %89 = arith.addf %87, %88 : vector<8x128xf32>
    %90 = arith.addf %61, %89 : vector<8x128xf32>
    %91 = arith.mulf %74, %74 : vector<8x128xf32>
    %92 = arith.mulf %79, %79 : vector<8x128xf32>
    %93 = arith.addf %91, %92 : vector<8x128xf32>
    %c2_23 = arith.constant 2 : index
    %c0_24 = arith.constant 0 : index
    %94 = vector.load %arg5[%c2_23, %c0_24] : memref<14x128xf32, #tpu.memory_space<vmem>>, vector<1x128xf32>
    %95 = vector.broadcast %94 : vector<1x128xf32> to vector<8x128xf32>
    %96 = arith.mulf %93, %95 : vector<8x128xf32>
    %97 = math.exp %96 : vector<8x128xf32>
    %98 = arith.addf %69, %97 : vector<8x128xf32>
    %99 = vector.extract_strided_slice %9 {offsets = [0, 9], sizes = [8, 1], strides = [1, 1]} : vector<8x42xf32> to vector<8x1xf32>
    %c9 = arith.constant 9 : index
    %c0_25 = arith.constant 0 : index
    %100 = vector.load %arg4[%c9, %c0_25] : memref<42x128xf32, #tpu.memory_space<vmem>>, vector<1x128xf32>
    %101 = vector.broadcast %99 : vector<8x1xf32> to vector<8x128xf32>
    %102 = vector.broadcast %100 : vector<1x128xf32> to vector<8x128xf32>
    %103 = arith.subf %101, %102 : vector<8x128xf32>
    %104 = vector.extract_strided_slice %9 {offsets = [0, 10], sizes = [8, 1], strides = [1, 1]} : vector<8x42xf32> to vector<8x1xf32>
    %c10 = arith.constant 10 : index
    %c0_26 = arith.constant 0 : index
    %105 = vector.load %arg4[%c10, %c0_26] : memref<42x128xf32, #tpu.memory_space<vmem>>, vector<1x128xf32>
    %106 = vector.broadcast %104 : vector<8x1xf32> to vector<8x128xf32>
    %107 = vector.broadcast %105 : vector<1x128xf32> to vector<8x128xf32>
    %108 = arith.subf %106, %107 : vector<8x128xf32>
    %109 = vector.extract_strided_slice %9 {offsets = [0, 11], sizes = [8, 1], strides = [1, 1]} : vector<8x42xf32> to vector<8x1xf32>
    %c11 = arith.constant 11 : index
    %c0_27 = arith.constant 0 : index
    %110 = vector.load %arg4[%c11, %c0_27] : memref<42x128xf32, #tpu.memory_space<vmem>>, vector<1x128xf32>
    %111 = vector.broadcast %109 : vector<8x1xf32> to vector<8x128xf32>
    %112 = vector.broadcast %110 : vector<1x128xf32> to vector<8x128xf32>
    %113 = arith.subf %111, %112 : vector<8x128xf32>
    %114 = math.absf %103 : vector<8x128xf32>
    %115 = math.absf %108 : vector<8x128xf32>
    %116 = arith.addf %114, %115 : vector<8x128xf32>
    %117 = math.absf %113 : vector<8x128xf32>
    %118 = arith.addf %116, %117 : vector<8x128xf32>
    %119 = arith.addf %90, %118 : vector<8x128xf32>
    %120 = arith.mulf %103, %103 : vector<8x128xf32>
    %121 = arith.mulf %108, %108 : vector<8x128xf32>
    %122 = arith.addf %120, %121 : vector<8x128xf32>
    %c3_28 = arith.constant 3 : index
    %c0_29 = arith.constant 0 : index
    %123 = vector.load %arg5[%c3_28, %c0_29] : memref<14x128xf32, #tpu.memory_space<vmem>>, vector<1x128xf32>
    %124 = vector.broadcast %123 : vector<1x128xf32> to vector<8x128xf32>
    %125 = arith.mulf %122, %124 : vector<8x128xf32>
    %126 = math.exp %125 : vector<8x128xf32>
    %127 = arith.addf %98, %126 : vector<8x128xf32>
    %128 = vector.extract_strided_slice %9 {offsets = [0, 12], sizes = [8, 1], strides = [1, 1]} : vector<8x42xf32> to vector<8x1xf32>
    %c12 = arith.constant 12 : index
    %c0_30 = arith.constant 0 : index
    %129 = vector.load %arg4[%c12, %c0_30] : memref<42x128xf32, #tpu.memory_space<vmem>>, vector<1x128xf32>
    %130 = vector.broadcast %128 : vector<8x1xf32> to vector<8x128xf32>
    %131 = vector.broadcast %129 : vector<1x128xf32> to vector<8x128xf32>
    %132 = arith.subf %130, %131 : vector<8x128xf32>
    %133 = vector.extract_strided_slice %9 {offsets = [0, 13], sizes = [8, 1], strides = [1, 1]} : vector<8x42xf32> to vector<8x1xf32>
    %c13 = arith.constant 13 : index
    %c0_31 = arith.constant 0 : index
    %134 = vector.load %arg4[%c13, %c0_31] : memref<42x128xf32, #tpu.memory_space<vmem>>, vector<1x128xf32>
    %135 = vector.broadcast %133 : vector<8x1xf32> to vector<8x128xf32>
    %136 = vector.broadcast %134 : vector<1x128xf32> to vector<8x128xf32>
    %137 = arith.subf %135, %136 : vector<8x128xf32>
    %138 = vector.extract_strided_slice %9 {offsets = [0, 14], sizes = [8, 1], strides = [1, 1]} : vector<8x42xf32> to vector<8x1xf32>
    %c14 = arith.constant 14 : index
    %c0_32 = arith.constant 0 : index
    %139 = vector.load %arg4[%c14, %c0_32] : memref<42x128xf32, #tpu.memory_space<vmem>>, vector<1x128xf32>
    %140 = vector.broadcast %138 : vector<8x1xf32> to vector<8x128xf32>
    %141 = vector.broadcast %139 : vector<1x128xf32> to vector<8x128xf32>
    %142 = arith.subf %140, %141 : vector<8x128xf32>
    %143 = math.absf %132 : vector<8x128xf32>
    %144 = math.absf %137 : vector<8x128xf32>
    %145 = arith.addf %143, %144 : vector<8x128xf32>
    %146 = math.absf %142 : vector<8x128xf32>
    %147 = arith.addf %145, %146 : vector<8x128xf32>
    %148 = arith.addf %119, %147 : vector<8x128xf32>
    %149 = arith.mulf %132, %132 : vector<8x128xf32>
    %150 = arith.mulf %137, %137 : vector<8x128xf32>
    %151 = arith.addf %149, %150 : vector<8x128xf32>
    %c4_33 = arith.constant 4 : index
    %c0_34 = arith.constant 0 : index
    %152 = vector.load %arg5[%c4_33, %c0_34] : memref<14x128xf32, #tpu.memory_space<vmem>>, vector<1x128xf32>
    %153 = vector.broadcast %152 : vector<1x128xf32> to vector<8x128xf32>
    %154 = arith.mulf %151, %153 : vector<8x128xf32>
    %155 = math.exp %154 : vector<8x128xf32>
    %156 = arith.addf %127, %155 : vector<8x128xf32>
    %157 = vector.extract_strided_slice %9 {offsets = [0, 15], sizes = [8, 1], strides = [1, 1]} : vector<8x42xf32> to vector<8x1xf32>
    %c15 = arith.constant 15 : index
    %c0_35 = arith.constant 0 : index
    %158 = vector.load %arg4[%c15, %c0_35] : memref<42x128xf32, #tpu.memory_space<vmem>>, vector<1x128xf32>
    %159 = vector.broadcast %157 : vector<8x1xf32> to vector<8x128xf32>
    %160 = vector.broadcast %158 : vector<1x128xf32> to vector<8x128xf32>
    %161 = arith.subf %159, %160 : vector<8x128xf32>
    %162 = vector.extract_strided_slice %9 {offsets = [0, 16], sizes = [8, 1], strides = [1, 1]} : vector<8x42xf32> to vector<8x1xf32>
    %c16 = arith.constant 16 : index
    %c0_36 = arith.constant 0 : index
    %163 = vector.load %arg4[%c16, %c0_36] : memref<42x128xf32, #tpu.memory_space<vmem>>, vector<1x128xf32>
    %164 = vector.broadcast %162 : vector<8x1xf32> to vector<8x128xf32>
    %165 = vector.broadcast %163 : vector<1x128xf32> to vector<8x128xf32>
    %166 = arith.subf %164, %165 : vector<8x128xf32>
    %167 = vector.extract_strided_slice %9 {offsets = [0, 17], sizes = [8, 1], strides = [1, 1]} : vector<8x42xf32> to vector<8x1xf32>
    %c17 = arith.constant 17 : index
    %c0_37 = arith.constant 0 : index
    %168 = vector.load %arg4[%c17, %c0_37] : memref<42x128xf32, #tpu.memory_space<vmem>>, vector<1x128xf32>
    %169 = vector.broadcast %167 : vector<8x1xf32> to vector<8x128xf32>
    %170 = vector.broadcast %168 : vector<1x128xf32> to vector<8x128xf32>
    %171 = arith.subf %169, %170 : vector<8x128xf32>
    %172 = math.absf %161 : vector<8x128xf32>
    %173 = math.absf %166 : vector<8x128xf32>
    %174 = arith.addf %172, %173 : vector<8x128xf32>
    %175 = math.absf %171 : vector<8x128xf32>
    %176 = arith.addf %174, %175 : vector<8x128xf32>
    %177 = arith.addf %148, %176 : vector<8x128xf32>
    %178 = arith.mulf %161, %161 : vector<8x128xf32>
    %179 = arith.mulf %166, %166 : vector<8x128xf32>
    %180 = arith.addf %178, %179 : vector<8x128xf32>
    %c5_38 = arith.constant 5 : index
    %c0_39 = arith.constant 0 : index
    %181 = vector.load %arg5[%c5_38, %c0_39] : memref<14x128xf32, #tpu.memory_space<vmem>>, vector<1x128xf32>
    %182 = vector.broadcast %181 : vector<1x128xf32> to vector<8x128xf32>
    %183 = arith.mulf %180, %182 : vector<8x128xf32>
    %184 = math.exp %183 : vector<8x128xf32>
    %185 = arith.addf %156, %184 : vector<8x128xf32>
    %186 = vector.extract_strided_slice %9 {offsets = [0, 18], sizes = [8, 1], strides = [1, 1]} : vector<8x42xf32> to vector<8x1xf32>
    %c18 = arith.constant 18 : index
    %c0_40 = arith.constant 0 : index
    %187 = vector.load %arg4[%c18, %c0_40] : memref<42x128xf32, #tpu.memory_space<vmem>>, vector<1x128xf32>
    %188 = vector.broadcast %186 : vector<8x1xf32> to vector<8x128xf32>
    %189 = vector.broadcast %187 : vector<1x128xf32> to vector<8x128xf32>
    %190 = arith.subf %188, %189 : vector<8x128xf32>
    %191 = vector.extract_strided_slice %9 {offsets = [0, 19], sizes = [8, 1], strides = [1, 1]} : vector<8x42xf32> to vector<8x1xf32>
    %c19 = arith.constant 19 : index
    %c0_41 = arith.constant 0 : index
    %192 = vector.load %arg4[%c19, %c0_41] : memref<42x128xf32, #tpu.memory_space<vmem>>, vector<1x128xf32>
    %193 = vector.broadcast %191 : vector<8x1xf32> to vector<8x128xf32>
    %194 = vector.broadcast %192 : vector<1x128xf32> to vector<8x128xf32>
    %195 = arith.subf %193, %194 : vector<8x128xf32>
    %196 = vector.extract_strided_slice %9 {offsets = [0, 20], sizes = [8, 1], strides = [1, 1]} : vector<8x42xf32> to vector<8x1xf32>
    %c20 = arith.constant 20 : index
    %c0_42 = arith.constant 0 : index
    %197 = vector.load %arg4[%c20, %c0_42] : memref<42x128xf32, #tpu.memory_space<vmem>>, vector<1x128xf32>
    %198 = vector.broadcast %196 : vector<8x1xf32> to vector<8x128xf32>
    %199 = vector.broadcast %197 : vector<1x128xf32> to vector<8x128xf32>
    %200 = arith.subf %198, %199 : vector<8x128xf32>
    %201 = math.absf %190 : vector<8x128xf32>
    %202 = math.absf %195 : vector<8x128xf32>
    %203 = arith.addf %201, %202 : vector<8x128xf32>
    %204 = math.absf %200 : vector<8x128xf32>
    %205 = arith.addf %203, %204 : vector<8x128xf32>
    %206 = arith.addf %177, %205 : vector<8x128xf32>
    %207 = arith.mulf %190, %190 : vector<8x128xf32>
    %208 = arith.mulf %195, %195 : vector<8x128xf32>
    %209 = arith.addf %207, %208 : vector<8x128xf32>
    %c6_43 = arith.constant 6 : index
    %c0_44 = arith.constant 0 : index
    %210 = vector.load %arg5[%c6_43, %c0_44] : memref<14x128xf32, #tpu.memory_space<vmem>>, vector<1x128xf32>
    %211 = vector.broadcast %210 : vector<1x128xf32> to vector<8x128xf32>
    %212 = arith.mulf %209, %211 : vector<8x128xf32>
    %213 = math.exp %212 : vector<8x128xf32>
    %214 = arith.addf %185, %213 : vector<8x128xf32>
    %215 = vector.extract_strided_slice %9 {offsets = [0, 21], sizes = [8, 1], strides = [1, 1]} : vector<8x42xf32> to vector<8x1xf32>
    %c21 = arith.constant 21 : index
    %c0_45 = arith.constant 0 : index
    %216 = vector.load %arg4[%c21, %c0_45] : memref<42x128xf32, #tpu.memory_space<vmem>>, vector<1x128xf32>
    %217 = vector.broadcast %215 : vector<8x1xf32> to vector<8x128xf32>
    %218 = vector.broadcast %216 : vector<1x128xf32> to vector<8x128xf32>
    %219 = arith.subf %217, %218 : vector<8x128xf32>
    %220 = vector.extract_strided_slice %9 {offsets = [0, 22], sizes = [8, 1], strides = [1, 1]} : vector<8x42xf32> to vector<8x1xf32>
    %c22 = arith.constant 22 : index
    %c0_46 = arith.constant 0 : index
    %221 = vector.load %arg4[%c22, %c0_46] : memref<42x128xf32, #tpu.memory_space<vmem>>, vector<1x128xf32>
    %222 = vector.broadcast %220 : vector<8x1xf32> to vector<8x128xf32>
    %223 = vector.broadcast %221 : vector<1x128xf32> to vector<8x128xf32>
    %224 = arith.subf %222, %223 : vector<8x128xf32>
    %225 = vector.extract_strided_slice %9 {offsets = [0, 23], sizes = [8, 1], strides = [1, 1]} : vector<8x42xf32> to vector<8x1xf32>
    %c23 = arith.constant 23 : index
    %c0_47 = arith.constant 0 : index
    %226 = vector.load %arg4[%c23, %c0_47] : memref<42x128xf32, #tpu.memory_space<vmem>>, vector<1x128xf32>
    %227 = vector.broadcast %225 : vector<8x1xf32> to vector<8x128xf32>
    %228 = vector.broadcast %226 : vector<1x128xf32> to vector<8x128xf32>
    %229 = arith.subf %227, %228 : vector<8x128xf32>
    %230 = math.absf %219 : vector<8x128xf32>
    %231 = math.absf %224 : vector<8x128xf32>
    %232 = arith.addf %230, %231 : vector<8x128xf32>
    %233 = math.absf %229 : vector<8x128xf32>
    %234 = arith.addf %232, %233 : vector<8x128xf32>
    %235 = arith.addf %206, %234 : vector<8x128xf32>
    %236 = arith.mulf %219, %219 : vector<8x128xf32>
    %237 = arith.mulf %224, %224 : vector<8x128xf32>
    %238 = arith.addf %236, %237 : vector<8x128xf32>
    %c7_48 = arith.constant 7 : index
    %c0_49 = arith.constant 0 : index
    %239 = vector.load %arg5[%c7_48, %c0_49] : memref<14x128xf32, #tpu.memory_space<vmem>>, vector<1x128xf32>
    %240 = vector.broadcast %239 : vector<1x128xf32> to vector<8x128xf32>
    %241 = arith.mulf %238, %240 : vector<8x128xf32>
    %242 = math.exp %241 : vector<8x128xf32>
    %243 = arith.addf %214, %242 : vector<8x128xf32>
    %244 = vector.extract_strided_slice %9 {offsets = [0, 24], sizes = [8, 1], strides = [1, 1]} : vector<8x42xf32> to vector<8x1xf32>
    %c24 = arith.constant 24 : index
    %c0_50 = arith.constant 0 : index
    %245 = vector.load %arg4[%c24, %c0_50] : memref<42x128xf32, #tpu.memory_space<vmem>>, vector<1x128xf32>
    %246 = vector.broadcast %244 : vector<8x1xf32> to vector<8x128xf32>
    %247 = vector.broadcast %245 : vector<1x128xf32> to vector<8x128xf32>
    %248 = arith.subf %246, %247 : vector<8x128xf32>
    %249 = vector.extract_strided_slice %9 {offsets = [0, 25], sizes = [8, 1], strides = [1, 1]} : vector<8x42xf32> to vector<8x1xf32>
    %c25 = arith.constant 25 : index
    %c0_51 = arith.constant 0 : index
    %250 = vector.load %arg4[%c25, %c0_51] : memref<42x128xf32, #tpu.memory_space<vmem>>, vector<1x128xf32>
    %251 = vector.broadcast %249 : vector<8x1xf32> to vector<8x128xf32>
    %252 = vector.broadcast %250 : vector<1x128xf32> to vector<8x128xf32>
    %253 = arith.subf %251, %252 : vector<8x128xf32>
    %254 = vector.extract_strided_slice %9 {offsets = [0, 26], sizes = [8, 1], strides = [1, 1]} : vector<8x42xf32> to vector<8x1xf32>
    %c26 = arith.constant 26 : index
    %c0_52 = arith.constant 0 : index
    %255 = vector.load %arg4[%c26, %c0_52] : memref<42x128xf32, #tpu.memory_space<vmem>>, vector<1x128xf32>
    %256 = vector.broadcast %254 : vector<8x1xf32> to vector<8x128xf32>
    %257 = vector.broadcast %255 : vector<1x128xf32> to vector<8x128xf32>
    %258 = arith.subf %256, %257 : vector<8x128xf32>
    %259 = math.absf %248 : vector<8x128xf32>
    %260 = math.absf %253 : vector<8x128xf32>
    %261 = arith.addf %259, %260 : vector<8x128xf32>
    %262 = math.absf %258 : vector<8x128xf32>
    %263 = arith.addf %261, %262 : vector<8x128xf32>
    %264 = arith.addf %235, %263 : vector<8x128xf32>
    %265 = arith.mulf %248, %248 : vector<8x128xf32>
    %266 = arith.mulf %253, %253 : vector<8x128xf32>
    %267 = arith.addf %265, %266 : vector<8x128xf32>
    %c8_53 = arith.constant 8 : index
    %c0_54 = arith.constant 0 : index
    %268 = vector.load %arg5[%c8_53, %c0_54] : memref<14x128xf32, #tpu.memory_space<vmem>>, vector<1x128xf32>
    %269 = vector.broadcast %268 : vector<1x128xf32> to vector<8x128xf32>
    %270 = arith.mulf %267, %269 : vector<8x128xf32>
    %271 = math.exp %270 : vector<8x128xf32>
    %272 = arith.addf %243, %271 : vector<8x128xf32>
    %273 = vector.extract_strided_slice %9 {offsets = [0, 27], sizes = [8, 1], strides = [1, 1]} : vector<8x42xf32> to vector<8x1xf32>
    %c27 = arith.constant 27 : index
    %c0_55 = arith.constant 0 : index
    %274 = vector.load %arg4[%c27, %c0_55] : memref<42x128xf32, #tpu.memory_space<vmem>>, vector<1x128xf32>
    %275 = vector.broadcast %273 : vector<8x1xf32> to vector<8x128xf32>
    %276 = vector.broadcast %274 : vector<1x128xf32> to vector<8x128xf32>
    %277 = arith.subf %275, %276 : vector<8x128xf32>
    %278 = vector.extract_strided_slice %9 {offsets = [0, 28], sizes = [8, 1], strides = [1, 1]} : vector<8x42xf32> to vector<8x1xf32>
    %c28 = arith.constant 28 : index
    %c0_56 = arith.constant 0 : index
    %279 = vector.load %arg4[%c28, %c0_56] : memref<42x128xf32, #tpu.memory_space<vmem>>, vector<1x128xf32>
    %280 = vector.broadcast %278 : vector<8x1xf32> to vector<8x128xf32>
    %281 = vector.broadcast %279 : vector<1x128xf32> to vector<8x128xf32>
    %282 = arith.subf %280, %281 : vector<8x128xf32>
    %283 = vector.extract_strided_slice %9 {offsets = [0, 29], sizes = [8, 1], strides = [1, 1]} : vector<8x42xf32> to vector<8x1xf32>
    %c29 = arith.constant 29 : index
    %c0_57 = arith.constant 0 : index
    %284 = vector.load %arg4[%c29, %c0_57] : memref<42x128xf32, #tpu.memory_space<vmem>>, vector<1x128xf32>
    %285 = vector.broadcast %283 : vector<8x1xf32> to vector<8x128xf32>
    %286 = vector.broadcast %284 : vector<1x128xf32> to vector<8x128xf32>
    %287 = arith.subf %285, %286 : vector<8x128xf32>
    %288 = math.absf %277 : vector<8x128xf32>
    %289 = math.absf %282 : vector<8x128xf32>
    %290 = arith.addf %288, %289 : vector<8x128xf32>
    %291 = math.absf %287 : vector<8x128xf32>
    %292 = arith.addf %290, %291 : vector<8x128xf32>
    %293 = arith.addf %264, %292 : vector<8x128xf32>
    %294 = arith.mulf %277, %277 : vector<8x128xf32>
    %295 = arith.mulf %282, %282 : vector<8x128xf32>
    %296 = arith.addf %294, %295 : vector<8x128xf32>
    %c9_58 = arith.constant 9 : index
    %c0_59 = arith.constant 0 : index
    %297 = vector.load %arg5[%c9_58, %c0_59] : memref<14x128xf32, #tpu.memory_space<vmem>>, vector<1x128xf32>
    %298 = vector.broadcast %297 : vector<1x128xf32> to vector<8x128xf32>
    %299 = arith.mulf %296, %298 : vector<8x128xf32>
    %300 = math.exp %299 : vector<8x128xf32>
    %301 = arith.addf %272, %300 : vector<8x128xf32>
    %302 = vector.extract_strided_slice %9 {offsets = [0, 30], sizes = [8, 1], strides = [1, 1]} : vector<8x42xf32> to vector<8x1xf32>
    %c30 = arith.constant 30 : index
    %c0_60 = arith.constant 0 : index
    %303 = vector.load %arg4[%c30, %c0_60] : memref<42x128xf32, #tpu.memory_space<vmem>>, vector<1x128xf32>
    %304 = vector.broadcast %302 : vector<8x1xf32> to vector<8x128xf32>
    %305 = vector.broadcast %303 : vector<1x128xf32> to vector<8x128xf32>
    %306 = arith.subf %304, %305 : vector<8x128xf32>
    %307 = vector.extract_strided_slice %9 {offsets = [0, 31], sizes = [8, 1], strides = [1, 1]} : vector<8x42xf32> to vector<8x1xf32>
    %c31 = arith.constant 31 : index
    %c0_61 = arith.constant 0 : index
    %308 = vector.load %arg4[%c31, %c0_61] : memref<42x128xf32, #tpu.memory_space<vmem>>, vector<1x128xf32>
    %309 = vector.broadcast %307 : vector<8x1xf32> to vector<8x128xf32>
    %310 = vector.broadcast %308 : vector<1x128xf32> to vector<8x128xf32>
    %311 = arith.subf %309, %310 : vector<8x128xf32>
    %312 = vector.extract_strided_slice %9 {offsets = [0, 32], sizes = [8, 1], strides = [1, 1]} : vector<8x42xf32> to vector<8x1xf32>
    %c32 = arith.constant 32 : index
    %c0_62 = arith.constant 0 : index
    %313 = vector.load %arg4[%c32, %c0_62] : memref<42x128xf32, #tpu.memory_space<vmem>>, vector<1x128xf32>
    %314 = vector.broadcast %312 : vector<8x1xf32> to vector<8x128xf32>
    %315 = vector.broadcast %313 : vector<1x128xf32> to vector<8x128xf32>
    %316 = arith.subf %314, %315 : vector<8x128xf32>
    %317 = math.absf %306 : vector<8x128xf32>
    %318 = math.absf %311 : vector<8x128xf32>
    %319 = arith.addf %317, %318 : vector<8x128xf32>
    %320 = math.absf %316 : vector<8x128xf32>
    %321 = arith.addf %319, %320 : vector<8x128xf32>
    %322 = arith.addf %293, %321 : vector<8x128xf32>
    %323 = arith.mulf %306, %306 : vector<8x128xf32>
    %324 = arith.mulf %311, %311 : vector<8x128xf32>
    %325 = arith.addf %323, %324 : vector<8x128xf32>
    %c10_63 = arith.constant 10 : index
    %c0_64 = arith.constant 0 : index
    %326 = vector.load %arg5[%c10_63, %c0_64] : memref<14x128xf32, #tpu.memory_space<vmem>>, vector<1x128xf32>
    %327 = vector.broadcast %326 : vector<1x128xf32> to vector<8x128xf32>
    %328 = arith.mulf %325, %327 : vector<8x128xf32>
    %329 = math.exp %328 : vector<8x128xf32>
    %330 = arith.addf %301, %329 : vector<8x128xf32>
    %331 = vector.extract_strided_slice %9 {offsets = [0, 33], sizes = [8, 1], strides = [1, 1]} : vector<8x42xf32> to vector<8x1xf32>
    %c33 = arith.constant 33 : index
    %c0_65 = arith.constant 0 : index
    %332 = vector.load %arg4[%c33, %c0_65] : memref<42x128xf32, #tpu.memory_space<vmem>>, vector<1x128xf32>
    %333 = vector.broadcast %331 : vector<8x1xf32> to vector<8x128xf32>
    %334 = vector.broadcast %332 : vector<1x128xf32> to vector<8x128xf32>
    %335 = arith.subf %333, %334 : vector<8x128xf32>
    %336 = vector.extract_strided_slice %9 {offsets = [0, 34], sizes = [8, 1], strides = [1, 1]} : vector<8x42xf32> to vector<8x1xf32>
    %c34 = arith.constant 34 : index
    %c0_66 = arith.constant 0 : index
    %337 = vector.load %arg4[%c34, %c0_66] : memref<42x128xf32, #tpu.memory_space<vmem>>, vector<1x128xf32>
    %338 = vector.broadcast %336 : vector<8x1xf32> to vector<8x128xf32>
    %339 = vector.broadcast %337 : vector<1x128xf32> to vector<8x128xf32>
    %340 = arith.subf %338, %339 : vector<8x128xf32>
    %341 = vector.extract_strided_slice %9 {offsets = [0, 35], sizes = [8, 1], strides = [1, 1]} : vector<8x42xf32> to vector<8x1xf32>
    %c35 = arith.constant 35 : index
    %c0_67 = arith.constant 0 : index
    %342 = vector.load %arg4[%c35, %c0_67] : memref<42x128xf32, #tpu.memory_space<vmem>>, vector<1x128xf32>
    %343 = vector.broadcast %341 : vector<8x1xf32> to vector<8x128xf32>
    %344 = vector.broadcast %342 : vector<1x128xf32> to vector<8x128xf32>
    %345 = arith.subf %343, %344 : vector<8x128xf32>
    %346 = math.absf %335 : vector<8x128xf32>
    %347 = math.absf %340 : vector<8x128xf32>
    %348 = arith.addf %346, %347 : vector<8x128xf32>
    %349 = math.absf %345 : vector<8x128xf32>
    %350 = arith.addf %348, %349 : vector<8x128xf32>
    %351 = arith.addf %322, %350 : vector<8x128xf32>
    %352 = arith.mulf %335, %335 : vector<8x128xf32>
    %353 = arith.mulf %340, %340 : vector<8x128xf32>
    %354 = arith.addf %352, %353 : vector<8x128xf32>
    %c11_68 = arith.constant 11 : index
    %c0_69 = arith.constant 0 : index
    %355 = vector.load %arg5[%c11_68, %c0_69] : memref<14x128xf32, #tpu.memory_space<vmem>>, vector<1x128xf32>
    %356 = vector.broadcast %355 : vector<1x128xf32> to vector<8x128xf32>
    %357 = arith.mulf %354, %356 : vector<8x128xf32>
    %358 = math.exp %357 : vector<8x128xf32>
    %359 = arith.addf %330, %358 : vector<8x128xf32>
    %360 = vector.extract_strided_slice %9 {offsets = [0, 36], sizes = [8, 1], strides = [1, 1]} : vector<8x42xf32> to vector<8x1xf32>
    %c36 = arith.constant 36 : index
    %c0_70 = arith.constant 0 : index
    %361 = vector.load %arg4[%c36, %c0_70] : memref<42x128xf32, #tpu.memory_space<vmem>>, vector<1x128xf32>
    %362 = vector.broadcast %360 : vector<8x1xf32> to vector<8x128xf32>
    %363 = vector.broadcast %361 : vector<1x128xf32> to vector<8x128xf32>
    %364 = arith.subf %362, %363 : vector<8x128xf32>
    %365 = vector.extract_strided_slice %9 {offsets = [0, 37], sizes = [8, 1], strides = [1, 1]} : vector<8x42xf32> to vector<8x1xf32>
    %c37 = arith.constant 37 : index
    %c0_71 = arith.constant 0 : index
    %366 = vector.load %arg4[%c37, %c0_71] : memref<42x128xf32, #tpu.memory_space<vmem>>, vector<1x128xf32>
    %367 = vector.broadcast %365 : vector<8x1xf32> to vector<8x128xf32>
    %368 = vector.broadcast %366 : vector<1x128xf32> to vector<8x128xf32>
    %369 = arith.subf %367, %368 : vector<8x128xf32>
    %370 = vector.extract_strided_slice %9 {offsets = [0, 38], sizes = [8, 1], strides = [1, 1]} : vector<8x42xf32> to vector<8x1xf32>
    %c38 = arith.constant 38 : index
    %c0_72 = arith.constant 0 : index
    %371 = vector.load %arg4[%c38, %c0_72] : memref<42x128xf32, #tpu.memory_space<vmem>>, vector<1x128xf32>
    %372 = vector.broadcast %370 : vector<8x1xf32> to vector<8x128xf32>
    %373 = vector.broadcast %371 : vector<1x128xf32> to vector<8x128xf32>
    %374 = arith.subf %372, %373 : vector<8x128xf32>
    %375 = math.absf %364 : vector<8x128xf32>
    %376 = math.absf %369 : vector<8x128xf32>
    %377 = arith.addf %375, %376 : vector<8x128xf32>
    %378 = math.absf %374 : vector<8x128xf32>
    %379 = arith.addf %377, %378 : vector<8x128xf32>
    %380 = arith.addf %351, %379 : vector<8x128xf32>
    %381 = arith.mulf %364, %364 : vector<8x128xf32>
    %382 = arith.mulf %369, %369 : vector<8x128xf32>
    %383 = arith.addf %381, %382 : vector<8x128xf32>
    %c12_73 = arith.constant 12 : index
    %c0_74 = arith.constant 0 : index
    %384 = vector.load %arg5[%c12_73, %c0_74] : memref<14x128xf32, #tpu.memory_space<vmem>>, vector<1x128xf32>
    %385 = vector.broadcast %384 : vector<1x128xf32> to vector<8x128xf32>
    %386 = arith.mulf %383, %385 : vector<8x128xf32>
    %387 = math.exp %386 : vector<8x128xf32>
    %388 = arith.addf %359, %387 : vector<8x128xf32>
    %389 = vector.extract_strided_slice %9 {offsets = [0, 39], sizes = [8, 1], strides = [1, 1]} : vector<8x42xf32> to vector<8x1xf32>
    %c39 = arith.constant 39 : index
    %c0_75 = arith.constant 0 : index
    %390 = vector.load %arg4[%c39, %c0_75] : memref<42x128xf32, #tpu.memory_space<vmem>>, vector<1x128xf32>
    %391 = vector.broadcast %389 : vector<8x1xf32> to vector<8x128xf32>
    %392 = vector.broadcast %390 : vector<1x128xf32> to vector<8x128xf32>
    %393 = arith.subf %391, %392 : vector<8x128xf32>
    %394 = vector.extract_strided_slice %9 {offsets = [0, 40], sizes = [8, 1], strides = [1, 1]} : vector<8x42xf32> to vector<8x1xf32>
    %c40 = arith.constant 40 : index
    %c0_76 = arith.constant 0 : index
    %395 = vector.load %arg4[%c40, %c0_76] : memref<42x128xf32, #tpu.memory_space<vmem>>, vector<1x128xf32>
    %396 = vector.broadcast %394 : vector<8x1xf32> to vector<8x128xf32>
    %397 = vector.broadcast %395 : vector<1x128xf32> to vector<8x128xf32>
    %398 = arith.subf %396, %397 : vector<8x128xf32>
    %399 = vector.extract_strided_slice %9 {offsets = [0, 41], sizes = [8, 1], strides = [1, 1]} : vector<8x42xf32> to vector<8x1xf32>
    %c41 = arith.constant 41 : index
    %c0_77 = arith.constant 0 : index
    %400 = vector.load %arg4[%c41, %c0_77] : memref<42x128xf32, #tpu.memory_space<vmem>>, vector<1x128xf32>
    %401 = vector.broadcast %399 : vector<8x1xf32> to vector<8x128xf32>
    %402 = vector.broadcast %400 : vector<1x128xf32> to vector<8x128xf32>
    %403 = arith.subf %401, %402 : vector<8x128xf32>
    %404 = math.absf %393 : vector<8x128xf32>
    %405 = math.absf %398 : vector<8x128xf32>
    %406 = arith.addf %404, %405 : vector<8x128xf32>
    %407 = math.absf %403 : vector<8x128xf32>
    %408 = arith.addf %406, %407 : vector<8x128xf32>
    %409 = arith.addf %380, %408 : vector<8x128xf32>
    %410 = arith.mulf %393, %393 : vector<8x128xf32>
    %411 = arith.mulf %398, %398 : vector<8x128xf32>
    %412 = arith.addf %410, %411 : vector<8x128xf32>
    %c13_78 = arith.constant 13 : index
    %c0_79 = arith.constant 0 : index
    %413 = vector.load %arg5[%c13_78, %c0_79] : memref<14x128xf32, #tpu.memory_space<vmem>>, vector<1x128xf32>
    %414 = vector.broadcast %413 : vector<1x128xf32> to vector<8x128xf32>
    %415 = arith.mulf %412, %414 : vector<8x128xf32>
    %416 = math.exp %415 : vector<8x128xf32>
    %417 = arith.addf %388, %416 : vector<8x128xf32>
    %418 = arith.index_cast %7 : i32 to index
    %c0_80 = arith.constant 0 : index
    %419 = vector.load %arg1[%418, %c0_80] : memref<8x4xf32, #tpu.memory_space<vmem>>, vector<8x4xf32>
    %cst_81 = arith.constant dense<0xFF800000> : vector<8xf32>
    %420 = vector.multi_reduction <maximumf>, %419, %cst_81 [1] : vector<8x4xf32> to vector<8xf32>
    %421 = vector.shape_cast %420 : vector<8xf32> to vector<8x1xf32>
    %422 = vector.broadcast %421 : vector<8x1xf32> to vector<8x4xf32>
    %423 = arith.subf %419, %422 : vector<8x4xf32>
    %424 = math.exp %423 : vector<8x4xf32>
    %cst_82 = arith.constant dense<0.000000e+00> : vector<8xf32>
    %425 = vector.multi_reduction <add>, %424, %cst_82 [1] : vector<8x4xf32> to vector<8xf32>
    %426 = vector.shape_cast %425 : vector<8xf32> to vector<8x1xf32>
    %427 = math.log %426 : vector<8x1xf32>
    %428 = arith.index_cast %7 : i32 to index
    %c0_83 = arith.constant 0 : index
    %429 = vector.load %arg7[%428, %c0_83] : memref<8x128xf32, #tpu.memory_space<vmem>>, vector<8x128xf32>
    %430 = vector.broadcast %421 : vector<8x1xf32> to vector<8x128xf32>
    %431 = arith.subf %429, %430 : vector<8x128xf32>
    %432 = vector.broadcast %427 : vector<8x1xf32> to vector<8x128xf32>
    %433 = arith.subf %431, %432 : vector<8x128xf32>
    %434 = math.exp %433 : vector<8x128xf32>
    %cst_84 = arith.constant 1.000000e+00 : f32
    %435 = vector.broadcast %cst_84 : f32 to vector<8x128xf32>
    %436 = arith.subf %435, %434 : vector<8x128xf32>
    %437 = arith.mulf %434, %434 : vector<8x128xf32>
    %cst_85 = arith.constant 7.500000e+01 : f32
    %438 = vector.broadcast %cst_85 : f32 to vector<8x128xf32>
    %439 = arith.mulf %438, %437 : vector<8x128xf32>
    %cst_86 = arith.constant 9.99999996E-13 : f32
    %440 = vector.broadcast %cst_86 : f32 to vector<8x128xf32>
    %441 = arith.addf %436, %440 : vector<8x128xf32>
    %442 = math.log %441 : vector<8x128xf32>
    %443 = arith.mulf %439, %442 : vector<8x128xf32>
    %444 = arith.mulf %436, %436 : vector<8x128xf32>
    %cst_87 = arith.constant 2.500000e+01 : f32
    %445 = vector.broadcast %cst_87 : f32 to vector<8x128xf32>
    %446 = arith.mulf %445, %444 : vector<8x128xf32>
    %447 = arith.mulf %446, %433 : vector<8x128xf32>
    %448 = arith.subf %443, %447 : vector<8x128xf32>
    %cst_88 = arith.constant 0.0357142873 : f32
    %449 = vector.broadcast %cst_88 : f32 to vector<8x128xf32>
    %450 = arith.mulf %449, %409 : vector<8x128xf32>
    %cst_89 = arith.constant -0.714285731 : f32
    %451 = vector.broadcast %cst_89 : f32 to vector<8x128xf32>
    %452 = arith.mulf %451, %417 : vector<8x128xf32>
    %453 = arith.addf %450, %452 : vector<8x128xf32>
    %454 = arith.addf %453, %448 : vector<8x128xf32>
    %455 = arith.index_cast %7 : i32 to index
    %c0_90 = arith.constant 0 : index
    %456 = vector.load %arg6[%455, %c0_90] : memref<8x128xf32, #tpu.memory_space<vmem>>, vector<8x128xf32>
    tpu.vector_store %arg6[%455, %c0_90], %454 {strides = array<i32>} : memref<8x128xf32, #tpu.memory_space<vmem>>, vector<8x128xf32>,
    %c1_i32_91 = arith.constant 1 : i32
    return
  }
  func.func @transform_0(%arg0: i32) -> (i32, i32) {
    %c0_i32 = arith.constant 0 : i32
    %c0_i32_0 = arith.constant 0 : i32
    return %arg0, %c0_i32 : i32, i32
  }
  func.func @transform_1(%arg0: i32) -> (i32, i32) {
    %c0_i32 = arith.constant 0 : i32
    %c0_i32_0 = arith.constant 0 : i32
    %c0_i32_1 = arith.constant 0 : i32
    return %c0_i32, %c0_i32_0 : i32, i32
  }
  func.func @transform_2(%arg0: i32) -> (i32, i32) {
    %c0_i32 = arith.constant 0 : i32
    %c0_i32_0 = arith.constant 0 : i32
    return %arg0, %c0_i32 : i32, i32
  }
  func.func @transform_3(%arg0: i32) -> (i32, i32) {
    %c0_i32 = arith.constant 0 : i32
    %c0_i32_0 = arith.constant 0 : i32
    %c0_i32_1 = arith.constant 0 : i32
    return %c0_i32, %c0_i32_0 : i32, i32
  }
  func.func @transform_4(%arg0: i32) -> (i32, i32) {
    %c0_i32 = arith.constant 0 : i32
    %c0_i32_0 = arith.constant 0 : i32
    %c0_i32_1 = arith.constant 0 : i32
    return %c0_i32, %c0_i32_0 : i32, i32
  }
  func.func @transform_5(%arg0: i32) -> (i32, i32) {
    %c0_i32 = arith.constant 0 : i32
    %c0_i32_0 = arith.constant 0 : i32
    return %arg0, %c0_i32 : i32, i32
  }
}

</mosaic_0001>

<bundles_post_ra>
// kernel: tpu_custom_call.1
= control target key start
LH: loop header
LB: loop body
LE: loop exit
PB: predicated region body
PF: predicated region fallthrough
CT: control target
= control target key end

     0   :  { %10 = vsyncpa [#allocation4], 0  ;;  %s2468_s0 = inlined_call_operand.vmem [shape: f32[16,4], index: 0, kind: input, shape index: {}]   ;;  %s2469_s1 = inlined_call_operand.hbm [shape: f32[4,128], index: 1, kind: input, shape index: {}]   ;;  %s2470_s2 = inlined_call_operand.vmem [shape: f32[16,42], index: 2, kind: input, shape index: {}]   ;;  %s2471_s3 = inlined_call_operand.hbm [shape: f32[42,128], index: 3, kind: input, shape index: {}]   ;;  %s2472_s4 = inlined_call_operand.vmem [shape: f32[14,128], index: 4, kind: input, shape index: {}]   ;;  %s2473_s5 = inlined_call_operand.hbm [shape: f32[16,128], index: 5, kind: output, shape index: {}]  }
   0x1   :  { %11 = vsyncpa [#allocation7], 0 }
   0x2   :  { %12 = vsyncpa [#allocation5], 0 }
   0x3   :  { %14 = vsyncpa [#allocation5 + $0x1], 0  ;;  %s2050_s18 = smov 0   ;;  %s2052_s19 = smov 0  }
   0x4   :  { %s2054_s20 = smov 0   ;;  %s2056_s21 = smov 0  }
   0x5 LB: > { %s2071_s22 = sadd.s32 4294967295, %s1969_s21   ;;  %s1536_s23 = sadd.s32 4294967294, %s1969_s21   ;;  %s1969_s21 = sphi %s2056_s21, %s2491_s21   ;;  %s1965_s20 = sphi %s2054_s20, %s2490_s20   ;;  %s1961_s19 = sphi %s2052_s19, %s2489_s19   ;;  %s1957_s18 = sphi %s2050_s18, %s2488_s18  }
   0x6   : > { %s2075_s24 = sadd.s32 1, %s1969_s21   ;;  %s142_s25 = sadd.s32 1, %s1965_s20 }
   0x7   : > { %s139_s26 = ssub.s32 %s1969_s21, %s2075_s24  ;;  %p152_p0 = scmp.ne.s32.totalorder %s1965_s20, %s1961_s19 }
   0x8   : > { %p140_p1 = scmp.eq.s32.totalorder %s139_s26, 0  ;;  %p153_p2 = scmp.eq.s32.totalorder %s2071_s22, 1 }
   0x9   : > { %p158_p3 = scmp.ne.s32.totalorder %s1961_s19, %s1957_s18  ;;  %p159_p4 = scmp.eq.s32.totalorder %s1536_s23, 1 }
   0xa   : > { %s2086_s27 = scalar_select %p140_p1, %s1965_s20, %s142_s25  }
   0xb   : > { %p2088_p5 = por %p153_p2, %p152_p0  ;;  %p2092_p6 = por %p159_p4, %p158_p3 }
   0xc   : > { %p1537_p7 = scmp.ge.s32.totalorder %s1969_s21, 1  ;;  %p166_p8 = scmp.lt.s32.totalorder %s1969_s21, 3 }
   0xd   : > { %s2477_s28 = scalar_select %p2088_p5, 1, 0 }
   0xe   : > { %s2478_s29 = scalar_select %p2092_p6, 1, 0 }
   0xf   : > { %p2474_p9 = scmp.eq.s32.totalorder %s2071_s22, 0  ;;  %p2099_p10 = pnand %p1537_p7, %p166_p8 }
  0x10   : > { %s1971_s6 = smov [#allocation3]   ;;  %s1972_s8 = smov [#allocation6]  }
  0x11   : > { %s2479_s30 = scalar_select %p2099_p10, 1, 0 }
  0x12   : > { %s179_s7 = sshll.u32 %s1971_s6, 4  ;;  %p1668_p11 = pneg %p2099_p10  ;;  %s180_s7 = int_to_ptr.vmem [resolvable:$true] %s179_s7 }
  0x13   : > { %s189_s9 = sshll.u32 %s1972_s8, 4  ;;  %s1843_s13 = scalar_lea.hbm %s2469_s1, 64  ;;  %s2111_s9 = int_to_ptr.vmem [resolvable:$true] %s189_s9 }
  0x14   : > { %p2107_p12 = pnand %p2474_p9, %p1668_p11  ;;  %p1844_p13 = scmp.ne.s32.totalorder %s2469_s1, %s1843_s13 }
  0x15   : > { %p1850_p3 = scmp.lt.u32.totalorder %s1843_s13, %s2469_s1 }
  0x16   : > { %p1845_p0 = pneg %p2107_p12 }
  0x18   : > { %p1846_p1 = pnand %p1845_p0, %p1844_p13 }
  0x1a   : > { %p1847_p2 = pneg %p1846_p1 }
  0x1c   : > { %p1852_p4 = pnand %p1850_p3, %p1847_p2 }
  0x1e   : > { %1855 = shalt.err (!%p1852_p4)
}
  0x1f   : > { %s1856_s23 = scalar_lea.vmem %s180_s7, 64  ;;  %p1864_p9 = scmp.lt.s32.totalorder %s180_s7, %s180_s7 }
  0x20   : > { %p1857_p7 = scmp.ne.s32.totalorder %s180_s7, %s1856_s23  ;;  %p1865_p6 = scmp.lt.s32.totalorder %s1856_s23, %s1856_s23 }
  0x22   : > { %p1859_p8 = pnand %p1857_p7, %p1845_p0  ;;  %p1866_p5 = por %p1865_p6, %p1864_p9 }
  0x24   : > { %p1860_p11 = pneg %p1859_p8 }
  0x26   : > { %p1867_p10 = pnand %p1866_p5, %p1860_p11 }
  0x28   : > { %1870 = shalt.err (!%p1867_p10)
}
  0x29   : > { %1671 = dma.hbm_to_vmem [thread:$0]  (!%p2107_p12), %s2469_s1, 64, %s180_s7, [#allocation4]  }
  0x2a   : > { %s1871_s11 = scalar_lea.hbm %s2471_s3, 768 }
  0x2b   : > { %p1872_p13 = scmp.ne.s32.totalorder %s2471_s3, %s1871_s11  ;;  %p1878_p9 = scmp.lt.u32.totalorder %s1871_s11, %s2471_s3 }
  0x2d   : > { %p1874_p6 = pnand %p1872_p13, %p1845_p0 }
  0x2f   : > { %p1875_p5 = pneg %p1874_p6 }
  0x31   : > { %p1880_p10 = pnand %p1878_p9, %p1875_p5 }
  0x33   : > { %1883 = shalt.err (!%p1880_p10)
}
  0x34   : > { %s1884_s7 = scalar_lea.vmem %s2111_s9, 768  ;;  %p1892_p4 = scmp.lt.s32.totalorder %s2111_s9, %s2111_s9 }
  0x35   : > { %p1885_p1 = scmp.ne.s32.totalorder %s2111_s9, %s1884_s7  ;;  %p1893_p7 = scmp.lt.s32.totalorder %s1884_s7, %s1884_s7 }
  0x37   : > { %p1887_p2 = pnand %p1885_p1, %p1845_p0  ;;  %p1894_p8 = por %p1893_p7, %p1892_p4 }
  0x39   : > { %p1888_p3 = pneg %p1887_p2 }
  0x3b   : > { %p1895_p11 = pnand %p1894_p8, %p1888_p3 }
  0x3d   : > { %1898 = shalt.err (!%p1895_p11)
}
  0x3e   : > { %s1973_s16 = smov 128   ;;  %s1974_s17 = smov 8  }
  0x3f   : > { %1674 = dma.hbm_to_vmem [thread:$0]  (!%p2107_p12), %s2471_s3, 768, %s2111_s9, [#allocation7], %s1973_s16, %s1973_s16, %s1974_s17  }
  0x40   : > { %p2481_p13 = scmp.ne.s32.totalorder %s2479_s30, 0 }
  0x41   : > { %p2482_p0 = scmp.eq.s32.totalorder (!%p2481_p13), %s2071_s22, 0 }
  0x42   : > { %222 = sbr.rel (%p2481_p13) target bundleno = 451 (0x1c3), region = 40 }
  0x49   : > { %1944 = dma.done.wait (%p2482_p0), [#allocation4], 64   ;;  %p2483_p6 = pmov %p2482_p0 }
  0x4a   : > { %p2484_p5 = pmov %p2482_p0 }
  0x4b   : > { %1946 = vsyncadd (%p2483_p6), [#allocation4], 4294967232 }
  0x4c   : > { %1948 = dma.done.wait (%p2484_p5), [#allocation7], 768   ;;  %p2485_p9 = pmov %p2482_p0 }
  0x4d   : > { %p257_p10 = scmp.lt.s32.totalorder %s2071_s22, 1  ;;  %v1975_v0 = vmov 1   ;;  %v1976_v1 = vmov 0.0   ;;  %vm1977_vm0 = vmmov 0   ;;  %v1978_v2 = vmov 0   ;;  %s1604_s11 = sshll.u32 %s2071_s22, 7 }
  0x4e   : > { %1950 = vsyncadd (%p2485_p9), [#allocation7], 4294966528  ;;  %1765 = vset.pattern.permute.xlu1 %v1975_v0  ;;  %1619 = vmatprep.subr.mxu1 %v1976_v1  ;;  %vm267_vm1 = vcmask 31744   ;;  %vm271_vm2 = vcmask 1043456   ;;  %v266_v5 = vld [vmem:[#allocation3] sm:$0xf]  ;;  %s2426_s7 = scalar_lea.hbm %s2473_s5, %s1604_s11 }
  0x4f   : > { %s258_s9 = scalar_select %p257_p10, %s2071_s22, 1  ;;  %1634 = vmatprep.subr.mxu0 %v1976_v1  ;;  %1621 = vmatprep.mubr.msk.f32.mxu1 %vm1977_vm0, %v1976_v1  ;;  %v273_v8 = vsel %vm271_vm2, %v266_v5, 0  ;;  %v1979_v13 = vmov 2   ;;  %v1980_v18 = vmov 3   ;;  %v1981_v21 = vmov 4  }
  0x50   : > { %1636 = vmatprep.mubr.msk.f32.mxu0 %vm1977_vm0, %v1976_v1  ;;  %1764 = vset.pattern.permute.xlu0 %v1978_v2  ;;  %v276_v10 = vand.u32 4294901760, %v273_v8  ;;  %v1982_v22 = vmov 5   ;;  %v1983_v23 = vmov 6   ;;  %v1984_v24 = vmov 10   ;;  %v1551_v60 = vld [vmem:[#allocation6 + $0x3] ss:$0 sm:$0xff] }
  0x51   : > { %s1545_s30 = sshll.u32 %s258_s9, 3  ;;  %v1985_v25 = vmov 7   ;;  %v1986_v26 = vmov 12   ;;  %v1987_v27 = vmov 8   ;;  %v1988_v28 = vmov 13   ;;  %p2486_p1 = scmp.ne.s32.totalorder %s2477_s28, 0 }
  0x52   : > { %s264_s6 = scalar_lea.vmem %s2470_s2, %s1545_s30  ;;  %s260_s12 = scalar_lea.vmem %s2468_s0, %s1545_s30  ;;  %1620 = vmatpush3.msra.mxu1 %v276_v10  ;;  %v353_v12 = vsub.f32 %v273_v8, %v276_v10  ;;  %1635 = vmatpush3.msra.mxu0 %v276_v10  ;;  %v1989_v29 = vmov 9   ;;  %v1990_v30 = vmov 15   ;;  %v1991_v31 = vmov 16   ;;  %v1552_v63 = vld [vmem:[#allocation6 + $0x4] ss:$0 sm:$0xff] }
  0x53   : > { %v2180_v3 = vld [vmem:[%s264_s6] sm:$0xff]  ;;  %1624 = vmatprep.subr.mxu1 %v1976_v1  ;;  %1639 = vmatprep.subr.mxu0 %v1976_v1  ;;  %v1992_v32 = vmov 18   ;;  %v1993_v33 = vmov 21   ;;  %v1994_v34 = vmov 19   ;;  %v1995_v35 = vmov 22   ;;  %s254_s6 = sand.u32 1, %s1961_s19  }
  0x54   : > { %v2182_v4 = vld [vmem:[%s260_s12] sm:$0xff]  ;;  %736 = vperm.xlu1 %1765, %v2180_v3   ;;  %v354_v15 = vand.u32 4294901760, %v353_v12  ;;  %v1996_v36 = vmov 24   ;;  %v1997_v37 = vmov 25   ;;  %v1998_v38 = vmov 28   ;;  %s1544_s8 = sshll.u32 %s254_s6, 3 }
  0x55   : > { %v1397_v6 = vsel %vm267_vm1, %v2182_v4, -inf  ;;  %v269_v7 = vsel %vm267_vm1, %v2182_v4, 0  ;;  %v1999_v39 = vmov 27   ;;  %v2000_v40 = vmov 11   ;;  %s256_s12 = scalar_lea.vmem [#allocation8], %s1544_s8  ;;  %s1430_s16 = scalar_lea.sflag [#allocation5], %s254_s6 }
  0x56   : > { %1398 = vmax.xlane.f32.xlu0 %v1397_v6  ;;  %v341_v9 = vand.u32 4294901760, %v269_v7  ;;  %v355_v17 = vsub.f32 %v353_v12, %v354_v15  ;;  %v2001_v41 = vmov 30   ;;  %v2002_v42 = vmov 14   ;;  %s1443_s13 = sshll.u32 %s256_s12, 4  ;;  %s2019_s22 = smov [#allocation8]   ;;  %s2428_s13 = int_to_ptr.vmem [resolvable:$true] %s1443_s13 }
  0x57   : > { %v2003_v43 = vmov 31   ;;  %v2004_v44 = vmov 17   ;;  %v2005_v45 = vmov 33   ;;  %v2006_v46 = vmov 20   ;;  %s1899_s17 = scalar_lea.vmem %s2428_s13, 128  ;;  %s1903_s23 = sshll.u32 %s2019_s22, 4  ;;  %s1904_s23 = int_to_ptr.vmem [resolvable:$false] %s1903_s23 }
  0x58   : > { %v342_v11 = vsub.f32 %v269_v7, %v341_v9  ;;  %1766 = vset.pattern.permute.xlu1 %v1979_v13  ;;  %v356_v20 = vand.u32 4294901760, %v355_v17  ;;  %v2007_v47 = vmov 34   ;;  %v2008_v48 = vmov 29   ;;  %p1900_p12 = scmp.ne.s32.totalorder %s2428_s13, %s1899_s17  ;;  %s1905_s25 = scalar_lea.vmem %s1904_s23, 256 }
  0x59   : > { %746 = vperm.xlu1 %1766, %v2180_v3   ;;  %v2009_v49 = vmov 36   ;;  %v2010_v50 = vmov 38   ;;  %v2011_v51 = vmov 37   ;;  %v2012_v52 = vmov 41   ;;  %p1906_p4 = scmp.lt.s32.totalorder %s2428_s13, %s1904_s23  ;;  %p1907_p7 = scmp.lt.s32.totalorder %s1905_s25, %s1899_s17 }
  0x5a   : > { %v343_v14 = vand.u32 4294901760, %v342_v11  ;;  %v2013_v53 = vmov 39   ;;  %v2014_v54 = vmov 40   ;;  %v2015_v55 = vmov 23   ;;  %p1901_p2 = pnand %p1900_p12, %p2486_p1 }
  0x5b   : > { %v2016_v56 = vmov 26   ;;  %v2017_v57 = vmov 32   ;;  %p1908_p8 = por %p1907_p7, %p1906_p4 }
  0x5c   : > { %v344_v16 = vsub.f32 %v342_v11, %v343_v14  ;;  %1637 = vmatmul.mubr.f32.vlgmr.msra.gmra.mrb[0].mxu0 %v343_v14  ;;  %p1902_p3 = pneg %p1901_p2 }
  0x5d   : > { %1640 = vmatpush3.msra.mxu0 %v354_v15  ;;  %1641 = vmatprep.mubr.msk.f32.mxu0 %vm1977_vm0, %v1976_v1 }
  0x5e   : > { %1767 = vset.pattern.permute.xlu1 %v1980_v18  ;;  %v345_v19 = vand.u32 4294901760, %v344_v16  ;;  %1644 = vmatprep.subr.mxu0 %v1976_v1  ;;  %v1549_v16 = vld [vmem:[#allocation6 + $0x2] ss:$0 sm:$0xff]  ;;  %v1547_v18 = vld [vmem:[#allocation6] ss:$0 sm:$0xff]  ;;  %p1909_p11 = pnand %p1908_p8, %p1902_p3 }
  0x5f   : > { %774 = vperm.xlu1 %1767, %v2180_v3  }
  0x60   : > { %1622 = vmatmul.mubr.f32.vlgmr.msra.gmra.mrb[0].mxu1 %v345_v19 }
  0x61   : > { %1625 = vmatpush3.msra.mxu1 %v356_v20  ;;  %1626 = vmatprep.mubr.msk.f32.mxu1 %vm1977_vm0, %v1976_v1  ;;  %v1554_v20 = vld [vmem:[%s2472_s4 + $0x1] ss:$0 sm:$0xff] }
  0x62   : > { %1629 = vmatprep.subr.mxu1 %v1976_v1 }
  0x63   : > { %1768 = vset.pattern.permute.xlu1 %v1981_v21 }
  0x64   : > { %784 = vperm.xlu1 %1768, %v2180_v3   ;;  %1642 = vmatmul.mubr.f32.vlgmr.msra.gmra.mrb[0].mxu0 %v341_v9 }
  0x65   : > { %1645 = vmatpush3.msra.mxu0 %v276_v10  ;;  %1646 = vmatprep.mubr.msk.f32.mxu0 %vm1977_vm0, %v1976_v1 }
  0x68   : > { %1769 = vset.pattern.permute.xlu1 %v1982_v22  ;;  %1627 = vmatmul.mubr.f32.vlgmr.msra.gmra.mrb[0].mxu1 %v341_v9 }
  0x69   : > { %794 = vperm.xlu1 %1769, %v2180_v3   ;;  %1630 = vmatpush3.msra.mxu1 %v353_v12  ;;  %v1548_v12 = vld [vmem:[#allocation6 + $0x1] ss:$0 sm:$0xff] }
  0x6a   : > { %1631 = vmatprep.mubr.msk.f32.mxu1 %vm1977_vm0, %v1976_v1 }
  0x6c   : > { %726 = vperm.xlu0 %1764, %v2180_v3   ;;  %1647 = vmatmul.mubr.f32.vlgmr.msra.gmra.mrb[0].mxu0 %v341_v9 }
  0x6d   : > { %1770 = vset.pattern.permute.xlu1 %v1983_v23 }
  0x6e   : > { %822 = vperm.xlu1 %1770, %v2180_v3  }
  0x70   : > { %1774 = vset.pattern.permute.xlu0 %v1984_v24  ;;  %1632 = vmatmul.mubr.f32.vlgmr.msra.gmra.mrb[0].mxu1 %v342_v11  ;;  %v1553_v11 = vld [vmem:[#allocation6 + $0x5] ss:$0 sm:$0xff]  ;;  %v1555_v24 = vld [vmem:[#allocation6 + $0x6] ss:$0 sm:$0xff] }
  0x71   : > { %880 = vperm.xlu0 %1774, %v2180_v3  }
  0x72   : > { %1771 = vset.pattern.permute.xlu1 %v1985_v25 }
  0x73   : > { %832 = vperm.xlu1 %1771, %v2180_v3  }
  0x75   : > { %1775 = vset.pattern.permute.xlu0 %v1986_v26 }
  0x76   : > { %918 = vperm.xlu0 %1775, %v2180_v3  }
  0x77   : > { %1772 = vset.pattern.permute.xlu1 %v1987_v27 }
  0x78   : > { %842 = vperm.xlu1 %1772, %v2180_v3  }
  0x7a   : > { %1776 = vset.pattern.permute.xlu0 %v1988_v28 }
  0x7b   : > { %928 = vperm.xlu0 %1776, %v2180_v3  }
  0x7c   : > { %1773 = vset.pattern.permute.xlu1 %v1989_v29 }
  0x7d   : > { %870 = vperm.xlu1 %1773, %v2180_v3  }
  0x7f   : > { %1777 = vset.pattern.permute.xlu0 %v1990_v30 }
  0x80   : > { %966 = vperm.xlu0 %1777, %v2180_v3  }
  0x81   : > { %1778 = vset.pattern.permute.xlu1 %v1991_v31 }
  0x82   : > { %976 = vperm.xlu1 %1778, %v2180_v3  }
  0x84   : > { %1779 = vset.pattern.permute.xlu0 %v1992_v32  ;;  %v1550_v32 = vld [vmem:[%s2472_s4] ss:$0 sm:$0xff] }
  0x85   : > { %1014 = vperm.xlu0 %1779, %v2180_v3  }
  0x86   : > { %1781 = vset.pattern.permute.xlu1 %v1993_v33 }
  0x87   : > { %1062 = vperm.xlu1 %1781, %v2180_v3  }
  0x89   : > { %1780 = vset.pattern.permute.xlu0 %v1994_v34 }
  0x8a   : > { %1024 = vperm.xlu0 %1780, %v2180_v3  }
  0x8b   : > { %1782 = vset.pattern.permute.xlu1 %v1995_v35 }
  0x8c   : > { %1072 = vperm.xlu1 %1782, %v2180_v3  }
  0x8e   : > { %1783 = vset.pattern.permute.xlu0 %v1996_v36 }
  0x8f   : > { %1110 = vperm.xlu0 %1783, %v2180_v3  }
  0x90   : > { %1784 = vset.pattern.permute.xlu1 %v1997_v37  ;;  %v1556_v37 = vld [vmem:[#allocation6 + $0x7] ss:$0 sm:$0xff] }
  0x91   : > { %1120 = vperm.xlu1 %1784, %v2180_v3  }
  0x93   : > { %1786 = vset.pattern.permute.xlu0 %v1998_v38 }
  0x94   : > { %1168 = vperm.xlu0 %1786, %v2180_v3  }
  0x95   : > { %1785 = vset.pattern.permute.xlu1 %v1999_v39 }
  0x96   : > { %1158 = vperm.xlu1 %1785, %v2180_v3  }
  0x98   : > { %1789 = vset.pattern.permute.xlu0 %v2000_v40 }
  0x99   : > { %890 = vperm.xlu0 %1789, %v2180_v3  }
  0x9a   : > { %1787 = vset.pattern.permute.xlu1 %v2001_v41 }
  0x9b   : > { %1206 = vperm.xlu1 %1787, %v2180_v3  }
  0x9d   : > { %1792 = vset.pattern.permute.xlu0 %v2002_v42 }
  0x9e   : > { %938 = vperm.xlu0 %1792, %v2180_v3  }
  0x9f   : > { %1788 = vset.pattern.permute.xlu1 %v2003_v43 }
  0xa0   : > { %1216 = vperm.xlu1 %1788, %v2180_v3  }
  0xa2   : > { %1795 = vset.pattern.permute.xlu0 %v2004_v44 }
  0xa3   : > { %986 = vperm.xlu0 %1795, %v2180_v3  }
  0xa4   : > { %1790 = vset.pattern.permute.xlu1 %v2005_v45 }
  0xa5   : > { %1254 = vperm.xlu1 %1790, %v2180_v3  }
  0xa7   : > { %1798 = vset.pattern.permute.xlu0 %v2006_v46 }
  0xa8   : > { %1034 = vperm.xlu0 %1798, %v2180_v3  }
  0xa9   : > { %1791 = vset.pattern.permute.xlu1 %v2007_v47 }
  0xaa   : > { %1264 = vperm.xlu1 %1791, %v2180_v3  }
  0xac   : > { %1801 = vset.pattern.permute.xlu0 %v2008_v48 }
  0xad   : > { %1178 = vperm.xlu0 %1801, %v2180_v3  }
  0xae   : > { %1793 = vset.pattern.permute.xlu1 %v2009_v49 }
  0xaf   : > { %1302 = vperm.xlu1 %1793, %v2180_v3  }
  0xb1   : > { %1804 = vset.pattern.permute.xlu0 %v2010_v50  ;;  %v1563_v50 = vld [vmem:[#allocation6 + $0xc] ss:$0 sm:$0xff] }
  0xb2   : > { %1322 = vperm.xlu0 %1804, %v2180_v3  }
  0xb3   : > { %1794 = vset.pattern.permute.xlu1 %v2011_v51 }
  0xb4   : > { %1312 = vperm.xlu1 %1794, %v2180_v3  }
  0xb6   : > { %1806 = vset.pattern.permute.xlu0 %v2012_v52 }
  0xb8   : > { %1796 = vset.pattern.permute.xlu1 %v2013_v53 }
  0xb9   : > { %1350 = vperm.xlu1 %1796, %v2180_v3  }
  0xbd   : > { %1797 = vset.pattern.permute.xlu1 %v2014_v54  ;;  %v1557_v54 = vld [vmem:[#allocation6 + $0x8] ss:$0 sm:$0xff] }
  0xbe   : > { %1360 = vperm.xlu1 %1797, %v2180_v3  }
  0xc2   : > { %1799 = vset.pattern.permute.xlu1 %v2015_v55 }
  0xc3   : > { %1082 = vperm.xlu1 %1799, %v2180_v3  }
  0xc7   : > { %1800 = vset.pattern.permute.xlu1 %v2016_v56  ;;  %v1558_v56 = vld [vmem:[%s2472_s4 + $0x2] ss:$0 sm:$0xff] }
  0xc8   : > { %1130 = vperm.xlu1 %1800, %v2180_v3  }
  0xcc   : > { %1802 = vset.pattern.permute.xlu1 %v2017_v57  ;;  %v1560_v57 = vld [vmem:[#allocation6 + $0xa] ss:$0 sm:$0xff] }
  0xd3   : > { %v737_v58 = vpop.permute.xlu1 %736 }
  0xd4   : > { %v743_v19 = vsub.f32 %v737_v58, %v1548_v12 }
  0xd6   : > { %v755_v28 = vand.u32 2147483647, %v743_v19  ;;  %v761_v29 = vmul.f32 %v743_v19, %v743_v19 }
  0xd8   : > { %v747_v59 = vpop.permute.xlu1 %746 }
  0xd9   : > { %v753_v22 = vsub.f32 %v747_v59, %v1549_v16  ;;  %v1567_v16 = vld [vmem:[#allocation6 + $0xf] ss:$0 sm:$0xff] }
  0xdb   : > { %v757_v34 = vand.u32 2147483647, %v753_v22 }
  0xde   : > { %v775_v61 = vpop.permute.xlu1 %774 }
  0xdf   : > { %v781_v62 = vsub.f32 %v775_v61, %v1551_v60 }
  0xe1   : > { %v802_v2 = vand.u32 2147483647, %v781_v62  ;;  %v808_v5 = vmul.f32 %v781_v62, %v781_v62 }
  0xe3   : > { %v2232_v0 = vpop.xlane.xlu0 %1398  ;;  %v785_v1 = vpop.permute.xlu1 %784 }
  0xe4   : > { %v1400_v6 = vsub.f32 %v2182_v4, %v2232_v0  ;;  %v791_v7 = vsub.f32 %v785_v1, %v1552_v63  ;;  %v1564_v63 = vld [vmem:[#allocation6 + $0xd] ss:$0 sm:$0xff] }
  0xe6   : > { %v1401_v8 = vmul.f32 1.442695, %v1400_v6  ;;  %v803_v9 = vand.u32 2147483647, %v791_v7  ;;  %v809_v10 = vmul.f32 %v791_v7, %v791_v7  ;;  %v1559_v6 = vld [vmem:[#allocation6 + $0x9] ss:$0 sm:$0xff] }
  0xe8   : > { %1807 = vpow2.f32 %v1401_v8  ;;  %v804_v13 = vadd.f32 %v803_v9, %v802_v2  ;;  %v810_v14 = vadd.f32 %v809_v10, %v808_v5  ;;  %v795_v15 = vpop.permute.xlu1 %794 }
  0xe9   : > { %v801_v17 = vsub.f32 %v795_v15, %v1553_v11 }
  0xea   : > { %v816_v25 = vmul.f32 %v1554_v20, %v810_v14 }
  0xeb   : > { %v805_v21 = vand.u32 2147483647, %v801_v17  ;;  %v727_v4 = vpop.permute.xlu0 %726 }
  0xec   : > { %v733_v23 = vsub.f32 %v727_v4, %v1547_v18  ;;  %v817_v39 = vmul.f32 1.442695, %v816_v25  ;;  %v1566_v18 = vld [vmem:[%s2472_s4 + $0x4] ss:$0 sm:$0xff]  ;;  %v1568_v4 = vld [vmem:[#allocation6 + $0x10] ss:$0 sm:$0xff] }
  0xed   : > { %v806_v26 = vadd.f32 %v805_v21, %v804_v13  ;;  %v823_v27 = vpop.permute.xlu1 %822 }
  0xee   : > { %v754_v30 = vand.u32 2147483647, %v733_v23  ;;  %v760_v31 = vmul.f32 %v733_v23, %v733_v23  ;;  %v829_v33 = vsub.f32 %v823_v27, %v1555_v24  ;;  %1809 = vpow2.f32 %v817_v39  ;;  %v1562_v24 = vld [vmem:[%s2472_s4 + $0x3] ss:$0 sm:$0xff]  ;;  %v1575_v39 = vld [vmem:[#allocation6 + $0x15] ss:$0 sm:$0xff] }
  0xf0   : > { %v756_v35 = vadd.f32 %v755_v28, %v754_v30  ;;  %v762_v36 = vadd.f32 %v761_v29, %v760_v31  ;;  %v881_v38 = vpop.permute.xlu0 %880  ;;  %v850_v44 = vand.u32 2147483647, %v829_v33  ;;  %v856_v45 = vmul.f32 %v829_v33, %v829_v33 }
  0xf1   : > { %v2248_v2 = vsub.f32 %v881_v38, %v1560_v57  ;;  %v1570_v38 = vld [vmem:[%s2472_s4 + $0x5] ss:$0 sm:$0xff] }
  0xf2   : > { %v1808_v40 = vpop.eup %1807  ;;  %v758_v41 = vadd.f32 %v757_v34, %v756_v35  ;;  %v768_v42 = vmul.f32 %v1550_v32, %v762_v36  ;;  %v833_v43 = vpop.permute.xlu1 %832  ;;  %v1571_v34 = vld [vmem:[#allocation6 + $0x12] ss:$0 sm:$0xff] }
  0xf3   : > { %v839_v46 = vsub.f32 %v833_v43, %v1556_v37  ;;  %v1403_v47 = vsel %vm267_vm1, %v1808_v40, 0.0  ;;  %v905_v13 = vmul.f32 %v2248_v2, %v2248_v2 }
  0xf4   : > { %v769_v48 = vmul.f32 1.442695, %v768_v42  ;;  %1404 = vadd.xlane.f32.xlu1 %v1403_v47  ;;  %v807_v49 = vadd.f32 %v806_v26, %v758_v41 }
  0xf5   : > { %v851_v51 = vand.u32 2147483647, %v839_v46  ;;  %v857_v53 = vmul.f32 %v839_v46, %v839_v46  ;;  %v919_v55 = vpop.permute.xlu0 %918 }
  0xf6   : > { %1811 = vpow2.f32 %v769_v48  ;;  %v2246_v61 = vsub.f32 %v919_v55, %v1563_v50  ;;  %v2018_v48 = vmov 35   ;;  %v1576_v50 = vld [vmem:[#allocation6 + $0x16] ss:$0 sm:$0xff] }
  0xf7   : > { %v852_v58 = vadd.f32 %v851_v51, %v850_v44  ;;  %v858_v59 = vadd.f32 %v857_v53, %v856_v45  ;;  %v843_v60 = vpop.permute.xlu1 %842  ;;  %v1572_v44 = vld [vmem:[#allocation6 + $0x13] ss:$0 sm:$0xff] }
  0xf8   : > { %v849_v62 = vsub.f32 %v843_v60, %v1557_v54  ;;  %v952_v9 = vmul.f32 %v2246_v61, %v2246_v61  ;;  %v1810_v19 = vpop.eup %1809 }
  0xf9   : > { %v864_v1 = vmul.f32 %v1558_v56, %v858_v59  ;;  %v1574_v59 = vld [vmem:[%s2472_s4 + $0x6] ss:$0 sm:$0xff] }
  0xfa   : > { %v853_v5 = vand.u32 2147483647, %v849_v62  ;;  %v929_v7 = vpop.permute.xlu0 %928 }
  0xfb   : > { %v865_v8 = vmul.f32 1.442695, %v864_v1  ;;  %v2252_v10 = vsub.f32 %v929_v7, %v1564_v63  ;;  %v1578_v1 = vld [vmem:[%s2472_s4 + $0x7] ss:$0 sm:$0xff] }
  0xfc   : > { %v854_v11 = vadd.f32 %v853_v5, %v852_v58  ;;  %v871_v12 = vpop.permute.xlu1 %870 }
  0xfd   : > { %1813 = vpow2.f32 %v865_v8  ;;  %v2256_v14 = vsub.f32 %v871_v12, %v1559_v6  ;;  %v953_v15 = vmul.f32 %v2252_v10, %v2252_v10 }
  0xfe   : > { %v2260_v17 = vadd.f32 %v854_v11, %v807_v49 }
  0xff   : > { %v904_v20 = vmul.f32 %v2256_v14, %v2256_v14  ;;  %v954_v21 = vadd.f32 %v953_v15, %v952_v9  ;;  %v967_v22 = vpop.permute.xlu0 %966 }
 0x100   : > { %v1812_v23 = vpop.eup %1811  ;;  %v2270_v25 = vsub.f32 %v967_v22, %v1567_v16 }
 0x101   : > { %v819_v26 = vadd.f32 %v1812_v23, %v1810_v19  ;;  %v906_v27 = vadd.f32 %v905_v13, %v904_v20  ;;  %v960_v28 = vmul.f32 %v1566_v18, %v954_v21  ;;  %v977_v29 = vpop.permute.xlu1 %976  ;;  %v1561_v20 = vld [vmem:[#allocation6 + $0xb] ss:$0 sm:$0xff]  ;;  %v898_v21 = vand.u32 2147483647, %v2256_v14 }
 0x102   : > { %v2272_v30 = vsub.f32 %v977_v29, %v1568_v4  ;;  %v1000_v31 = vmul.f32 %v2270_v25, %v2270_v25  ;;  %v947_v29 = vand.u32 2147483647, %v2252_v10 }
 0x103   : > { %v912_v32 = vmul.f32 %v1562_v24, %v906_v27  ;;  %v961_v33 = vmul.f32 1.442695, %v960_v28  ;;  %v946_v27 = vand.u32 2147483647, %v2246_v61  ;;  %v994_v61 = vand.u32 2147483647, %v2270_v25 }
 0x104   : > { %v1001_v35 = vmul.f32 %v2272_v30, %v2272_v30  ;;  %v1015_v36 = vpop.permute.xlu0 %1014 }
 0x105   : > { %v913_v37 = vmul.f32 1.442695, %v912_v32  ;;  %1226 = vperm.xlu1 %1802, %v2180_v3   ;;  %1815 = vpow2.f32 %v961_v33  ;;  %v2282_v41 = vsub.f32 %v1015_v36, %v1571_v34  ;;  %v948_v36 = vadd.f32 %v947_v29, %v946_v27  ;;  %v1579_v27 = vld [vmem:[#allocation6 + $0x18] ss:$0 sm:$0xff]  ;;  %v1583_v29 = vld [vmem:[#allocation6 + $0x1b] ss:$0 sm:$0xff] }
 0x106   : > { %v1002_v40 = vadd.f32 %v1001_v35, %v1000_v31  ;;  %v1063_v42 = vpop.permute.xlu1 %1062 }
 0x107   : > { %v1814_v43 = vpop.eup %1813  ;;  %1817 = vpow2.f32 %v913_v37  ;;  %v2284_v47 = vsub.f32 %v1063_v42, %v1575_v39  ;;  %v1048_v53 = vmul.f32 %v2282_v41, %v2282_v41  ;;  %v995_v42 = vand.u32 2147483647, %v2272_v30 }
 0x108   : > { %v867_v45 = vadd.f32 %v1814_v43, %v819_v26  ;;  %v1008_v46 = vmul.f32 %v1570_v38, %v1002_v40  ;;  %v1565_v26 = vld [vmem:[#allocation6 + $0xe] ss:$0 sm:$0xff]  ;;  %v1569_v40 = vld [vmem:[#allocation6 + $0x11] ss:$0 sm:$0xff]  ;;  %v1042_v30 = vand.u32 2147483647, %v2282_v41 }
 0x109   : > { %1803 = vset.pattern.permute.xlu1 %v2018_v48  ;;  %v1025_v49 = vpop.permute.xlu0 %1024  ;;  %v1096_v56 = vmul.f32 %v2284_v47, %v2284_v47  ;;  %v996_v48 = vadd.f32 %v995_v42, %v994_v61  ;;  %v1596_v42 = vld [vmem:[#allocation6 + $0x25] ss:$0 sm:$0xff] }
 0x10a   : > { %v1009_v51 = vmul.f32 1.442695, %v1008_v46  ;;  %v2288_v54 = vsub.f32 %v1025_v49, %v1572_v44  ;;  %1274 = vperm.xlu1 %1803, %v2180_v3  }
 0x10b   : > { %v1073_v55 = vpop.permute.xlu1 %1072 }
 0x10c   : > { %1819 = vpow2.f32 %v1009_v51  ;;  %v1049_v57 = vmul.f32 %v2288_v54, %v2288_v54  ;;  %v2295_v58 = vsub.f32 %v1073_v55, %v1576_v50  ;;  %v1043_v25 = vand.u32 2147483647, %v2288_v54 }
 0x10e   : > { %v1050_v60 = vadd.f32 %v1049_v57, %v1048_v53  ;;  %v1097_v62 = vmul.f32 %v2295_v58, %v2295_v58  ;;  %1805 = vset.pattern.permute.xlu1 %v2012_v52  ;;  %v2303_v63 = vpop.permute.xlu0 %1110  ;;  %v1573_v57 = vld [vmem:[#allocation6 + $0x14] ss:$0 sm:$0xff] }
 0x10f   : > { %1370 = vperm.xlu1 %1805, %v2180_v3   ;;  %v1816_v5 = vpop.eup %1815  ;;  %v899_v3 = vand.u32 2147483647, %v2248_v2 }
 0x110   : > { %v1056_v6 = vmul.f32 %v1574_v59, %v1050_v60  ;;  %v1098_v7 = vadd.f32 %v1097_v62, %v1096_v56  ;;  %v2309_v8 = vpop.permute.xlu1 %1120 }
 0x111   : > { %v1818_v9 = vpop.eup %1817  ;;  %v900_v28 = vadd.f32 %v899_v3, %v898_v21 }
 0x112   : > { %v915_v11 = vadd.f32 %v1818_v9, %v867_v45  ;;  %v1057_v12 = vmul.f32 1.442695, %v1056_v6  ;;  %v1104_v13 = vmul.f32 %v1578_v1, %v1098_v7  ;;  %v1577_v9 = vld [vmem:[#allocation6 + $0x17] ss:$0 sm:$0xff] }
 0x113   : > { %v2311_v15 = vpop.permute.xlu0 %1168 }
 0x114   : > { %v963_v52 = vadd.f32 %v1816_v5, %v915_v11  ;;  %1821 = vpow2.f32 %v1057_v12  ;;  %v1105_v16 = vmul.f32 1.442695, %v1104_v13  ;;  %v1044_v5 = vadd.f32 %v1043_v25, %v1042_v30 }
 0x115   : > { %v2313_v19 = vpop.permute.xlu1 %1158  ;;  %v1090_v12 = vand.u32 2147483647, %v2284_v47  ;;  %v1091_v13 = vand.u32 2147483647, %v2295_v58  ;;  %v2338_v47 = vsub.f32 %v2303_v63, %v1579_v27  ;;  %v1584_v58 = vld [vmem:[#allocation6 + $0x1c] ss:$0 sm:$0xff] }
 0x116   : > { %v1820_v18 = vpop.eup %1819  ;;  %1823 = vpow2.f32 %v1105_v16 }
 0x117   : > { %v1011_v4 = vadd.f32 %v1820_v18, %v963_v52  ;;  %v1092_v21 = vadd.f32 %v1091_v13, %v1090_v12 }
 0x118   : > { %v891_v22 = vpop.permute.xlu0 %890 }
 0x119   : > { %v897_v23 = vsub.f32 %v891_v22, %v1561_v20 }
 0x11a   : > { %v2317_v24 = vpop.permute.xlu1 %1206 }
 0x11b   : > { %v901_v31 = vand.u32 2147483647, %v897_v23 }
 0x11d   : > { %v902_v32 = vadd.f32 %v901_v31, %v900_v28  ;;  %v939_v33 = vpop.permute.xlu0 %938  ;;  %v1587_v31 = vld [vmem:[#allocation6 + $0x1e] ss:$0 sm:$0xff] }
 0x11e   : > { %v1822_v34 = vpop.eup %1821  ;;  %v945_v35 = vsub.f32 %v939_v33, %v1565_v26  ;;  %v1580_v26 = vld [vmem:[#allocation6 + $0x19] ss:$0 sm:$0xff]  ;;  %v2341_v33 = vsub.f32 %v2311_v15, %v1584_v58  ;;  %v2351_v63 = vsub.f32 %v2317_v24, %v1587_v31  ;;  %v1582_v24 = vld [vmem:[%s2472_s4 + $0x8] ss:$0 sm:$0xff] }
 0x11f   : > { %v1059_v2 = vadd.f32 %v1822_v34, %v1011_v4  ;;  %v903_v14 = vadd.f32 %v902_v32, %v2260_v17  ;;  %v1217_v39 = vpop.permute.xlu1 %1216  ;;  %v2335_v28 = vsub.f32 %v2309_v8, %v1580_v26  ;;  %v1588_v32 = vld [vmem:[#allocation6 + $0x1f] ss:$0 sm:$0xff]  ;;  %v2344_v34 = vsub.f32 %v2313_v19, %v1583_v29  ;;  %v1585_v29 = vld [vmem:[#allocation6 + $0x1d] ss:$0 sm:$0xff] }
 0x120   : > { %v1824_v37 = vpop.eup %1823  ;;  %v949_v38 = vand.u32 2147483647, %v945_v35  ;;  %v1144_v8 = vmul.f32 %v2338_v47, %v2338_v47  ;;  %v1193_v15 = vmul.f32 %v2341_v33, %v2341_v33 }
 0x121   : > { %v2324_v43 = vadd.f32 %v1824_v37, %v1059_v2  ;;  %v1145_v35 = vmul.f32 %v2335_v28, %v2335_v28  ;;  %v1592_v2 = vld [vmem:[#allocation6 + $0x22] ss:$0 sm:$0xff]  ;;  %v1192_v19 = vmul.f32 %v2344_v34, %v2344_v34 }
 0x122   : > { %v987_v10 = vpop.permute.xlu0 %986  ;;  %v950_v44 = vadd.f32 %v949_v38, %v948_v36  ;;  %v1591_v36 = vld [vmem:[#allocation6 + $0x21] ss:$0 sm:$0xff] }
 0x123   : > { %v993_v45 = vsub.f32 %v987_v10, %v1569_v40  ;;  %v1595_v40 = vld [vmem:[#allocation6 + $0x24] ss:$0 sm:$0xff]  ;;  %v1146_v61 = vadd.f32 %v1145_v35, %v1144_v8 }
 0x124   : > { %v1255_v46 = vpop.permute.xlu1 %1254  ;;  %v951_v50 = vadd.f32 %v950_v44, %v903_v14  ;;  %v2353_v14 = vsub.f32 %v1217_v39, %v1588_v32  ;;  %v1240_v39 = vmul.f32 %v2351_v63, %v2351_v63  ;;  %v1599_v44 = vld [vmem:[#allocation6 + $0x27] ss:$0 sm:$0xff] }
 0x125   : > { %v997_v49 = vand.u32 2147483647, %v993_v45  ;;  %v2359_v37 = vsub.f32 %v1255_v46, %v1591_v36  ;;  %v1600_v45 = vld [vmem:[#allocation6 + $0x28] ss:$0 sm:$0xff]  ;;  %v1187_v36 = vand.u32 2147483647, %v2341_v33 }
 0x126   : > { %v1241_v10 = vmul.f32 %v2353_v14, %v2353_v14 }
 0x127   : > { %v998_v51 = vadd.f32 %v997_v49, %v996_v48  ;;  %v1035_v59 = vpop.permute.xlu0 %1034  ;;  %v1194_v49 = vadd.f32 %v1193_v15, %v1192_v19  ;;  %v1234_v15 = vand.u32 2147483647, %v2351_v63 }
 0x128   : > { %v1041_v62 = vsub.f32 %v1035_v59, %v1573_v57 }
 0x129   : > { %v999_v53 = vadd.f32 %v998_v51, %v951_v50  ;;  %v1265_v17 = vpop.permute.xlu1 %1264  ;;  %v1288_v50 = vmul.f32 %v2359_v37, %v2359_v37 }
 0x12a   : > { %v1045_v6 = vand.u32 2147483647, %v1041_v62  ;;  %v2361_v38 = vsub.f32 %v1265_v17, %v1592_v2  ;;  %v1586_v17 = vld [vmem:[%s2472_s4 + $0x9] ss:$0 sm:$0xff]  ;;  %v1186_v2 = vand.u32 2147483647, %v2344_v34 }
 0x12b   : > { %v1200_v62 = vmul.f32 %v1586_v17, %v1194_v49  ;;  %v1593_v17 = vld [vmem:[#allocation6 + $0x23] ss:$0 sm:$0xff] }
 0x12c   : > { %v1046_v16 = vadd.f32 %v1045_v6, %v1044_v5  ;;  %v1289_v51 = vmul.f32 %v2361_v38, %v2361_v38  ;;  %v1179_v31 = vpop.permute.xlu0 %1178 }
 0x12d   : > { %v1201_v12 = vmul.f32 1.442695, %v1200_v62  ;;  %v1185_v19 = vsub.f32 %v1179_v31, %v1585_v29 }
 0x12e   : > { %v1303_v55 = vpop.permute.xlu1 %1302  ;;  %v1047_v4 = vadd.f32 %v1046_v16, %v999_v53  ;;  %v1152_v53 = vmul.f32 %v1582_v24, %v1146_v61  ;;  %v1290_v5 = vadd.f32 %v1289_v51, %v1288_v50  ;;  %v1581_v16 = vld [vmem:[#allocation6 + $0x1a] ss:$0 sm:$0xff]  ;;  %v1597_v24 = vld [vmem:[#allocation6 + $0x26] ss:$0 sm:$0xff]  ;;  %v1283_v51 = vand.u32 2147483647, %v2361_v38 }
 0x12f   : > { %v2370_v48 = vsub.f32 %v1303_v55, %v1595_v40  ;;  %v1242_v55 = vadd.f32 %v1241_v10, %v1240_v39  ;;  %v1189_v49 = vand.u32 2147483647, %v1185_v19 }
 0x130   : > { %v1153_v6 = vmul.f32 1.442695, %v1152_v53 }
 0x131   : > { %v1336_v30 = vmul.f32 %v2370_v48, %v2370_v48  ;;  %v1323_v39 = vpop.permute.xlu0 %1322 }
 0x132   : > { %1825 = vpow2.f32 %v1153_v6  ;;  %v1329_v53 = vsub.f32 %v1323_v39, %v1597_v24 }
 0x133   : > { %v1313_v56 = vpop.permute.xlu1 %1312  ;;  %1827 = vpow2.f32 %v1201_v12 }
 0x134   : > { %v2372_v46 = vsub.f32 %v1313_v56, %v1596_v42  ;;  %v1590_v56 = vld [vmem:[%s2472_s4 + $0xa] ss:$0 sm:$0xff]  ;;  %v1589_v42 = vld [vmem:[#allocation6 + $0x20] ss:$0 sm:$0xff] }
 0x136   : > { %v1337_v25 = vmul.f32 %v2372_v46, %v2372_v46 }
 0x138   : > { %v1351_v60 = vpop.permute.xlu1 %1350 }
 0x139   : > { %v2381_v57 = vsub.f32 %v1351_v60, %v1599_v44  ;;  %v1594_v60 = vld [vmem:[%s2472_s4 + $0xb] ss:$0 sm:$0xff]  ;;  %v1188_v44 = vadd.f32 %v1187_v36, %v1186_v2 }
 0x13a   : > { %v1296_v13 = vmul.f32 %v1594_v60, %v1290_v5 }
 0x13b   : > { %v1190_v6 = vadd.f32 %v1189_v49, %v1188_v44 }
 0x13c   : > { %v1297_v27 = vmul.f32 1.442695, %v1296_v13  ;;  %v1826_v61 = vpop.eup %1825 }
 0x13d   : > { %v1361_v1 = vpop.permute.xlu1 %1360  ;;  %v1828_v63 = vpop.eup %1827  ;;  %v1155_v50 = vadd.f32 %v1826_v61, %v2324_v43 }
 0x13e   : > { %v2383_v59 = vsub.f32 %v1361_v1, %v1600_v45  ;;  %v1384_v1 = vmul.f32 %v2381_v57, %v2381_v57 }
 0x13f   : > { %v717_v7 = vpop.f32.mrb[0].mxu0 }
 0x140   : > { %v1648_v11 = vpop.f32.mrb[1].mxu0 }
 0x141   : > { %v1338_v11 = vadd.f32 %v1337_v25, %v1336_v30 }
 0x142   : > { %v1083_v52 = vpop.permute.xlu1 %1082 }
 0x143   : > { %v1089_v18 = vsub.f32 %v1083_v52, %v1577_v9  ;;  %v497_v20 = vpop.f32.mrb[0].mxu1  ;;  %v1248_v9 = vmul.f32 %v1590_v56, %v1242_v55  ;;  %v1598_v52 = vld [vmem:[%s2472_s4 + $0xc] ss:$0 sm:$0xff]  ;;  %v1330_v55 = vand.u32 2147483647, %v2370_v48 }
 0x144   : > { %v2330_v3 = vadd.f32 %v717_v7, %v497_v20  ;;  %v1633_v41 = vpop.f32.mrb[1].mxu1  ;;  %v1385_v7 = vmul.f32 %v2383_v59, %v2383_v59  ;;  %v1331_v56 = vand.u32 2147483647, %v2372_v46  ;;  %v1378_v46 = vand.u32 2147483647, %v2381_v57 }
 0x145   : > { %v1093_v54 = vand.u32 2147483647, %v1089_v18  ;;  %v1249_v41 = vmul.f32 1.442695, %v1248_v9 }
 0x146   : > { %v1386_v20 = vadd.f32 %v1385_v7, %v1384_v1  ;;  %v1203_v7 = vadd.f32 %v1828_v63, %v1155_v50  ;;  %v1332_v38 = vadd.f32 %v1331_v56, %v1330_v55 }
 0x147   : > { %v1094_v22 = vadd.f32 %v1093_v54, %v1092_v21  ;;  %v1131_v18 = vpop.permute.xlu1 %1130  ;;  %v1602_v21 = vld [vmem:[%s2472_s4 + $0xd] ss:$0 sm:$0xff]  ;;  %v1139_v54 = vand.u32 2147483647, %v2335_v28  ;;  %1829 = vpow2.f32 %v1249_v41 }
 0x148   : > { %v1137_v26 = vsub.f32 %v1131_v18, %v1581_v16  ;;  %v1392_v58 = vmul.f32 %v1602_v21, %v1386_v20  ;;  %1831 = vpow2.f32 %v1297_v27  ;;  %v1409_v16 = vsub.f32 %v2330_v3, %v2232_v0 }
 0x149   : > { %v2332_v23 = vadd.f32 %v1094_v22, %v1047_v4  ;;  %v1138_v4 = vand.u32 2147483647, %v2338_v47  ;;  %v1344_v22 = vmul.f32 %v1598_v52, %v1338_v11  ;;  %v1235_v47 = vand.u32 2147483647, %v2353_v14  ;;  %v1601_v52 = vld [vmem:[#allocation6 + $0x29] ss:$0 sm:$0xff] }
 0x14a   : > { %v1141_v8 = vand.u32 2147483647, %v1137_v26  ;;  %v1393_v40 = vmul.f32 1.442695, %v1392_v58  ;;  %v1282_v14 = vand.u32 2147483647, %v2359_v37 }
 0x14b   : > { %v1140_v32 = vadd.f32 %v1139_v54, %v1138_v4  ;;  %v1345_v35 = vmul.f32 1.442695, %v1344_v22  ;;  %v1236_v33 = vadd.f32 %v1235_v47, %v1234_v15  ;;  %v1333_v37 = vand.u32 2147483647, %v1329_v53 }
 0x14c   : > { %v1284_v9 = vadd.f32 %v1283_v51, %v1282_v14 }
 0x14d   : > { %v1142_v10 = vadd.f32 %v1141_v8, %v1140_v32  ;;  %v1334_v58 = vadd.f32 %v1333_v37, %v1332_v38 }
 0x14f   : > { %v1143_v30 = vadd.f32 %v1142_v10, %v2332_v23  ;;  %v1379_v23 = vand.u32 2147483647, %v2383_v59 }
 0x151   : > { %v1830_v62 = vpop.eup %1829  ;;  %v1191_v12 = vadd.f32 %v1190_v6, %v1143_v30  ;;  %v1380_v31 = vadd.f32 %v1379_v23, %v1378_v46 }
 0x152   : > { %v1832_v43 = vpop.eup %1831  ;;  %v1251_v48 = vadd.f32 %v1830_v62, %v1203_v7 }
 0x154   : > { %v1299_v22 = vadd.f32 %v1832_v43, %v1251_v48 }
 0x181   : > { %v1405_v28 = vpop.xlane.xlu1 %1404 }
 0x182   : > { %1833 = vlog2.f32 %v1405_v28 }
 0x183   : > { %1835 = vpow2.f32 %v1345_v35 }
 0x184   : > { %1837 = vpow2.f32 %v1393_v40 }
 0x185   : > { %v1227_v45 = vpop.permute.xlu1 %1226 }
 0x186   : > { %v1233_v34 = vsub.f32 %v1227_v45, %v1589_v42 }
 0x188   : > { %v1237_v25 = vand.u32 2147483647, %v1233_v34 }
 0x189   : > { %v1275_v5 = vpop.permute.xlu1 %1274 }
 0x18a   : > { %v1238_v60 = vadd.f32 %v1237_v25, %v1236_v33  ;;  %v1281_v1 = vsub.f32 %v1275_v5, %v1593_v17 }
 0x18c   : > { %v1834_v11 = vpop.eup %1833  ;;  %v1285_v13 = vand.u32 2147483647, %v1281_v1  ;;  %v1239_v41 = vadd.f32 %v1238_v60, %v1191_v12 }
 0x18d   : > { %v1407_v18 = vmul.f32 0.6931472, %v1834_v11  ;;  %v1836_v20 = vpop.eup %1835 }
 0x18e   : > { %v1286_v21 = vadd.f32 %v1285_v13, %v1284_v9  ;;  %v1371_v54 = vpop.permute.xlu1 %1370  ;;  %v1838_v27 = vpop.eup %1837  ;;  %v1347_v57 = vadd.f32 %v1836_v20, %v1299_v22 }
 0x18f   : > { %v1410_v4 = vsub.f32 %v1409_v16, %v1407_v18  ;;  %v1377_v26 = vsub.f32 %v1371_v54, %v1601_v52 }
 0x190   : > { %v1287_v29 = vadd.f32 %v1286_v21, %v1239_v41  ;;  %v1395_v0 = vadd.f32 %v1838_v27, %v1347_v57 }
 0x191   : > { %v1411_v32 = vmul.f32 1.442695, %v1410_v4  ;;  %v1381_v35 = vand.u32 2147483647, %v1377_v26 }
 0x192   : > { %v1335_v59 = vadd.f32 %v1334_v58, %v1287_v29  ;;  %v1425_v2 = vmul.f32 -0.71428573, %v1395_v0 }
 0x193   : > { %1839 = vpow2.f32 %v1411_v32  ;;  %v1382_v8 = vadd.f32 %v1381_v35, %v1380_v31 }
 0x195   : > { %v1383_v3 = vadd.f32 %v1382_v8, %v1335_v59 }
 0x197   : > { %v1424_v36 = vmul.f32 0.035714287, %v1383_v3 }
 0x199   : > { %v1426_v15 = vadd.f32 %v1425_v2, %v1424_v36 }
 0x19d   : > { %v1840_v28 = vpop.eup %1839 }
 0x19e   : > { %v1413_v47 = vsub.f32 1.0, %v1840_v28  ;;  %v1414_v42 = vmul.f32 %v1840_v28, %v1840_v28 }
 0x1a0   : > { %v1416_v19 = vadd.f32 1e-12, %v1413_v47  ;;  %v1420_v40 = vmul.f32 %v1413_v47, %v1413_v47  ;;  %v1415_v39 = vmul.f32 75.0, %v1414_v42 }
 0x1a2   : > { %1841 = vlog2.f32 %v1416_v19  ;;  %v1421_v61 = vmul.f32 25.0, %v1420_v40 }
 0x1a4   : > { %v1422_v45 = vmul.f32 %v1421_v61, %v1410_v4 }
 0x1ac   : > { %v1842_v24 = vpop.eup %1841 }
 0x1ad   : > { %v1418_v10 = vmul.f32 0.6931472, %v1842_v24 }
 0x1af   : > { %v1419_v44 = vmul.f32 %v1418_v10, %v1415_v39 }
 0x1b1   : > { %v1423_v33 = vsub.f32 %v1419_v44, %v1422_v45 }
 0x1b3   : > { %v1427_v49 = vadd.f32 %v1426_v15, %v1423_v33 }
 0x1b5   : > { %1428 = vst [vmem:[%s256_s12] sm:$0xff] %v1427_v49 }
 0x1b6   : > { %1912 = shalt.err (!%p1909_p11)
}
 0x1b7   : > { %s1913_s9 = scalar_lea.hbm %s2426_s7, 128  ;;  %s1917_s26 = scalar_lea.hbm %s2473_s5, 256 }
 0x1b8   : > { %p1914_p13 = scmp.ne.s32.totalorder %s2426_s7, %s1913_s9  ;;  %p1918_p5 = scmp.lt.u32.totalorder %s2426_s7, %s2473_s5 }
 0x1b9   : > { %p1919_p9 = scmp.lt.u32.totalorder %s1917_s26, %s1913_s9  ;;  %p1921_p12 = scmp.lt.u32.totalorder %s1913_s9, %s2426_s7 }
 0x1ba   : > { %p1915_p0 = pnand %p1914_p13, %p2486_p1 }
 0x1bb   : > { %p1920_p10 = por %p1919_p9, %p1918_p5 }
 0x1bc   : > { %p1916_p6 = pneg %p1915_p0 }
 0x1bd   : > { %p1922_p2 = por %p1921_p12, %p1920_p10 }
 0x1bf   : > { %p1923_p3 = pnand %p1922_p2, %p1916_p6 }
 0x1c1   : > { %1926 = shalt.err (!%p1923_p3)
}
 0x1c2   : > { %1666 = dma.vmem_to_hbm [thread:$0]  (%p2486_p1), %s2428_s13, 128, %s2426_s7, %s1430_s16  }
 0x1c3 PF: > { %p1683_p4 = scmp.ge.s32.totalorder %s1969_s21, 2  ;;  %s1455_s11 = sand.u32 1, %s1957_s18  }
 0x1c4   : > { %p2487_p7 = scmp.ne.s32.totalorder %s2478_s29, 0  ;;  %s1456_s12 = scalar_lea.sflag [#allocation5], %s1455_s11 }
 0x1c6   : > { %p1676_p8 = pnand %p1683_p4, %p2487_p7 }
 0x1c8   : > { %1952 = dma.done.wait (!%p1676_p8), %s1456_s12, 128  }
 0x1c9   : > { %1954 = vsyncadd (!%p1676_p8), %s1456_s12, 4294967168  ;;  %p17_p11 = scmp.ge.s32.totalorder %s2075_s24, 4   ;;  %s2488_s18 = smov %s1961_s19 }
 0x1ca   : > { %s2489_s19 = smov %s1965_s20  ;;  %s2490_s20 = smov %s2086_s27 }
 0x1cb   : > { %s2491_s21 = smov %s2075_s24  ;;  %19 = sbr.rel (!%p17_p11) target bundleno = 5 (0x5), region = 87 }
 0x1d2   :  { %1461 = vsyncpa [#allocation4], 1 }
 0x1d3   :  { %1463 = vsyncpa [#allocation4 + $0x1], 1 }
 0x1d4   :  { %1464 = vsyncpa [#allocation7], 1 }
 0x1d5   :  { %1465 = vsyncpa [#allocation5], 1 }
 0x1d6   :  { %1467 = vsyncpa [#allocation5 + $0x1], 1 }

</bundles_post_ra>
